<compile_context>
chip_gen: v6e
topology: v6e:2x2x1
jax: 0.10.0
libtpu: 0.0.40
codegen_flags: <defaults>
</compile_context>

<pallas_src>
import jax
import jax.numpy as jnp
from jax.experimental import pallas as pl
from jax.experimental.pallas import tpu as pltpu

# TODO(synk): WhisperFeatureExtractor (log-mel spectrogram), the Whisper encoder and the
#             full T5 seq2seq stack are pretrained external models and are not re-implemented.
# TODO(synk): nn.Dropout(0.1) is treated as identity (inference / eval mode). A training-mode
#             kernel would add pltpu.prng_seed / pltpu.prng_random_bits masking.


def _round_up(a, b):
    return ((a + b - 1) // b) * b


def connector_kernel(x_ref, w1_ref, b1_ref, w2_ref, b2_ref, o_ref):
    """Fused MLP connector tile: relu(x @ W1 + b1) @ W2 + b2.

    x / W1 / W2 arrive in bf16 (MXU-native); accumulation is f32; biases & output f32.
    Dropout(p=0.1) is the identity at inference time, so it is not materialized.
    """
    h = jnp.dot(x_ref[...], w1_ref[...], preferred_element_type=jnp.float32)
    h = jnp.maximum(h + b1_ref[...], 0.0)                      # bias add + ReLU (VPU)
    # nn.Dropout(0.1): identity at inference time.
    y = jnp.dot(h.astype(w2_ref.dtype), w2_ref[...],
                preferred_element_type=jnp.float32)
    o_ref[...] = (y + b2_ref[...]).astype(o_ref.dtype)


def connector_forward(encoder_hidden_states, w1, b1, w2, b2, *,
                      row_tile=256, compute_dtype=jnp.bfloat16):
    """Apply the 'mlp' connector to Whisper encoder hidden states.

    encoder_hidden_states: (B, S, whisper_dim) float32
    returns:               (B, S, t5_dim)      float32
    """
    B, S, whisper_dim = encoder_hidden_states.shape
    hidden = w1.shape[1]
    t5_dim = w2.shape[1]

    M = B * S
    x2d = encoder_hidden_states.reshape(M, whisper_dim)

    # Effective row tile: at most `row_tile`, at least covers all rows (rounded to sublane=8).
    # Real Whisper shapes (B*1500 rows) tile at 256 -> many parallel grid steps (keeps both
    # v7x TensorCores busy); the toy case collapses to a single block.
    row_tile_eff = min(row_tile, _round_up(M, 8))
    M_pad = _round_up(M, row_tile_eff)
    if M_pad != M:
        x2d = jnp.pad(x2d, ((0, M_pad - M), (0, 0)))

    # bf16 matmul inputs (MXU native on v5e/v6e/v7x); f32 biases / accumulation / output.
    x_lo = x2d.astype(compute_dtype)
    w1_lo = w1.astype(compute_dtype)
    w2_lo = w2.astype(compute_dtype)
    b1_2d = b1.reshape(1, hidden).astype(jnp.float32)
    b2_2d = b2.reshape(1, t5_dim).astype(jnp.float32)

    grid = (M_pad // row_tile_eff,)

    out2d = pl.pallas_call(
        connector_kernel,
        out_shape=jax.ShapeDtypeStruct((M_pad, t5_dim), jnp.float32),
        grid=grid,
        in_specs=[
            pl.BlockSpec((row_tile_eff, whisper_dim), lambda i: (i, 0)),   # x tile (pipelined)
            pl.BlockSpec((whisper_dim, hidden),       lambda i: (0, 0)),   # W1 (grid-invariant)
            pl.BlockSpec((1, hidden),                 lambda i: (0, 0)),   # b1
            pl.BlockSpec((hidden, t5_dim),            lambda i: (0, 0)),   # W2 (grid-invariant)
            pl.BlockSpec((1, t5_dim),                 lambda i: (0, 0)),   # b2
        ],
        out_specs=pl.BlockSpec((row_tile_eff, t5_dim), lambda i: (i, 0)),
        compiler_params=pltpu.CompilerParams(
            dimension_semantics=("parallel",),
            vmem_limit_bytes=32 * 1024 * 1024,
        ),
    )(x_lo, w1_lo, b1_2d, w2_lo, b2_2d)

    return out2d[:M].reshape(B, S, t5_dim)


def init_connector_params(key, whisper_dim, hidden_size, t5_dim):
    """Deterministic init mimicking nn.Linear (uniform ±1/sqrt(fan_in))."""
    k1, k2, k3, k4 = jax.random.split(key, 4)
    lim1 = 1.0 / jnp.sqrt(whisper_dim)
    lim2 = 1.0 / jnp.sqrt(hidden_size)
    # stored as (in_features, out_features) so the kernel does x @ W
    w1 = jax.random.uniform(k1, (whisper_dim, hidden_size), jnp.float32, -lim1, lim1)
    b1 = jax.random.uniform(k2, (hidden_size,), jnp.float32, -lim1, lim1)
    w2 = jax.random.uniform(k3, (hidden_size, t5_dim), jnp.float32, -lim2, lim2)
    b2 = jax.random.uniform(k4, (t5_dim,), jnp.float32, -lim2, lim2)
    return w1, b1, w2, b2


if __name__ == "__main__":
    # whisper-base d_model = 512, connector hidden_size = 512, t5-base d_model = 768
    B, S = 2, 16
    WHISPER_DIM, HIDDEN, T5_DIM = 512, 512, 768

    key = jax.random.PRNGKey(0)
    k_x, k_p = jax.random.split(key)

    # stand-in for whisper.encoder(input_features).last_hidden_state
    encoder_hidden_states = jax.random.normal(k_x, (B, S, WHISPER_DIM), jnp.float32)

    w1, b1, w2, b2 = init_connector_params(k_p, WHISPER_DIM, HIDDEN, T5_DIM)

    projected = connector_forward(encoder_hidden_states, w1, b1, w2, b2)
    projected = jax.block_until_ready(projected)

    # reference check (plain JAX) mirroring the kernel's bf16-input / f32-accum numerics
    x2d = encoder_hidden_states.reshape(B * S, WHISPER_DIM)
    h_ref = jnp.maximum(
        jnp.dot(x2d.astype(jnp.bfloat16), w1.astype(jnp.bfloat16),
                preferred_element_type=jnp.float32) + b1, 0.0)
    ref = jnp.dot(h_ref.astype(jnp.bfloat16), w2.astype(jnp.bfloat16),
                  preferred_element_type=jnp.float32) + b2
    ref = ref.reshape(B, S, T5_DIM)

    assert projected.shape == (B, S, T5_DIM)
    assert jnp.allclose(projected, ref, atol=1e-2, rtol=1e-2)

    print("KERNEL_OK")
</pallas_src>

<mosaic_0001>
module attributes {stable_mosaic.version = 11 : i64} {
  func.func @connector_kernel(%arg0: i32, %arg1: memref<32x512xbf16, #tpu.memory_space<vmem>>, %arg2: memref<512x512xbf16, #tpu.memory_space<vmem>>, %arg3: memref<1x512xf32, #tpu.memory_space<vmem>>, %arg4: memref<512x768xbf16, #tpu.memory_space<vmem>>, %arg5: memref<1x768xf32, #tpu.memory_space<vmem>>, %arg6: memref<32x768xf32, #tpu.memory_space<vmem>>) attributes {dimension_semantics = [#tpu.dimension_semantics<parallel>], iteration_bounds = array<i64: 1>, scalar_prefetch = 0 : i64, scratch_operands = 0 : i64, tpu.core_type = #tpu.core_type<tc>, window_params = [{transform_indices = @transform_0, window_bounds = array<i64: 32, 512>}, {pipeline_mode = #tpu.pipeline_mode<synchronous>, transform_indices = @transform_1, window_bounds = array<i64: 512, 512>}, {pipeline_mode = #tpu.pipeline_mode<synchronous>, transform_indices = @transform_2, window_bounds = array<i64: 1, 512>}, {pipeline_mode = #tpu.pipeline_mode<synchronous>, transform_indices = @transform_3, window_bounds = array<i64: 512, 768>}, {pipeline_mode = #tpu.pipeline_mode<synchronous>, transform_indices = @transform_4, window_bounds = array<i64: 1, 768>}, {transform_indices = @transform_5, window_bounds = array<i64: 32, 768>}]} {
    %c0 = arith.constant 0 : index
    %c0_0 = arith.constant 0 : index
    %0 = vector.load %arg1[%c0, %c0_0] : memref<32x512xbf16, #tpu.memory_space<vmem>>, vector<32x512xbf16>
    %c0_1 = arith.constant 0 : index
    %c0_2 = arith.constant 0 : index
    %1 = vector.load %arg2[%c0_1, %c0_2] : memref<512x512xbf16, #tpu.memory_space<vmem>>, vector<512x512xbf16>
    %cst = arith.constant dense<0.000000e+00> : vector<32x512xf32>
    %2 = tpu.matmul %0, %1, %cst {dimension_numbers = #tpu.dot_dimension_numbers<[1], [0], [0], [1], [0, 0, 1, 1], [], []>} : vector<32x512xbf16>, vector<512x512xbf16>, vector<32x512xf32> -> vector<32x512xf32>
    %c0_3 = arith.constant 0 : index
    %c0_4 = arith.constant 0 : index
    %3 = vector.load %arg3[%c0_3, %c0_4] : memref<1x512xf32, #tpu.memory_space<vmem>>, vector<1x512xf32>
    %4 = vector.broadcast %3 : vector<1x512xf32> to vector<32x512xf32>
    %5 = arith.addf %2, %4 : vector<32x512xf32>
    %cst_5 = arith.constant 0.000000e+00 : f32
    %6 = vector.broadcast %cst_5 : f32 to vector<32x512xf32>
    %7 = arith.maximumf %5, %6 : vector<32x512xf32>
    %8 = arith.truncf %7 : vector<32x512xf32> to vector<32x512xbf16>
    %c0_6 = arith.constant 0 : index
    %c0_7 = arith.constant 0 : index
    %9 = vector.load %arg4[%c0_6, %c0_7] : memref<512x768xbf16, #tpu.memory_space<vmem>>, vector<512x768xbf16>
    %cst_8 = arith.constant dense<0.000000e+00> : vector<32x768xf32>
    %10 = tpu.matmul %8, %9, %cst_8 {dimension_numbers = #tpu.dot_dimension_numbers<[1], [0], [0], [1], [0, 0, 1, 1], [], []>} : vector<32x512xbf16>, vector<512x768xbf16>, vector<32x768xf32> -> vector<32x768xf32>
    %c0_9 = arith.constant 0 : index
    %c0_10 = arith.constant 0 : index
    %11 = vector.load %arg5[%c0_9, %c0_10] : memref<1x768xf32, #tpu.memory_space<vmem>>, vector<1x768xf32>
    %12 = vector.broadcast %11 : vector<1x768xf32> to vector<32x768xf32>
    %13 = arith.addf %10, %12 : vector<32x768xf32>
    %c0_11 = arith.constant 0 : index
    %c0_12 = arith.constant 0 : index
    %14 = vector.load %arg6[%c0_11, %c0_12] : memref<32x768xf32, #tpu.memory_space<vmem>>, vector<32x768xf32>
    tpu.vector_store %arg6[%c0_11, %c0_12], %13 {strides = array<i32>} : memref<32x768xf32, #tpu.memory_space<vmem>>, vector<32x768xf32>,
    return
  }
  func.func @transform_0(%arg0: i32) -> (i32, i32) {
    %c0_i32 = arith.constant 0 : i32
    %c0_i32_0 = arith.constant 0 : i32
    return %arg0, %c0_i32 : i32, i32
  }
  func.func @transform_1(%arg0: i32) -> (i32, i32) {
    %c0_i32 = arith.constant 0 : i32
    %c0_i32_0 = arith.constant 0 : i32
    %c0_i32_1 = arith.constant 0 : i32
    return %c0_i32, %c0_i32_0 : i32, i32
  }
  func.func @transform_2(%arg0: i32) -> (i32, i32) {
    %c0_i32 = arith.constant 0 : i32
    %c0_i32_0 = arith.constant 0 : i32
    %c0_i32_1 = arith.constant 0 : i32
    return %c0_i32, %c0_i32_0 : i32, i32
  }
  func.func @transform_3(%arg0: i32) -> (i32, i32) {
    %c0_i32 = arith.constant 0 : i32
    %c0_i32_0 = arith.constant 0 : i32
    %c0_i32_1 = arith.constant 0 : i32
    return %c0_i32, %c0_i32_0 : i32, i32
  }
  func.func @transform_4(%arg0: i32) -> (i32, i32) {
    %c0_i32 = arith.constant 0 : i32
    %c0_i32_0 = arith.constant 0 : i32
    %c0_i32_1 = arith.constant 0 : i32
    return %c0_i32, %c0_i32_0 : i32, i32
  }
  func.func @transform_5(%arg0: i32) -> (i32, i32) {
    %c0_i32 = arith.constant 0 : i32
    %c0_i32_0 = arith.constant 0 : i32
    return %arg0, %c0_i32 : i32, i32
  }
}

</mosaic_0001>

<bundles_post_ra>
// kernel: tpu_custom_call.1
= control target key start
LH: loop header
LB: loop body
LE: loop exit
PB: predicated region body
PF: predicated region fallthrough
CT: control target
= control target key end

     0   :  { %10 = vsyncpa [#allocation3], 0  ;;  %s3801_s0 = inlined_call_operand.hbm [shape: bf16[32,512], index: 0, kind: input, shape index: {}]   ;;  %s3802_s1 = inlined_call_operand.hbm [shape: bf16[512,512], index: 1, kind: input, shape index: {}]   ;;  %s3803_s2 = inlined_call_operand.hbm [shape: f32[1,512], index: 2, kind: input, shape index: {}]   ;;  %s3804_s3 = inlined_call_operand.hbm [shape: bf16[512,768], index: 3, kind: input, shape index: {}]   ;;  %s3805_s4 = inlined_call_operand.vmem [shape: f32[1,768], index: 4, kind: input, shape index: {}]   ;;  %s3806_s5 = inlined_call_operand.hbm [shape: f32[32,768], index: 5, kind: output, shape index: {}]  }
   0x1   :  { %11 = vsyncpa [#allocation6], 0 }
   0x2   :  { %12 = vsyncpa [#allocation9], 0 }
   0x3   :  { %13 = vsyncpa [#allocation4], 0  ;;  %s3632_s18 = smov [#allocation5]   ;;  %s3633_s20 = smov [#allocation2]  }
   0x4   :  { %s31_s19 = sshll.u32 %s3632_s18, 4  ;;  %s19_s21 = sshll.u32 %s3633_s20, 4  ;;  %s32_s19 = int_to_ptr.vmem [resolvable:$true] %s31_s19  ;;  %s20_s21 = int_to_ptr.vmem [resolvable:$true] %s19_s21 }
   0x5   :  { %s3532_s22 = scalar_lea.vmem %s32_s19, 16384  ;;  %p3537_p1 = scmp.lt.s32.totalorder %s32_s19, %s32_s19 }
   0x6   :  { %p3533_p0 = scmp.ne.s32.totalorder %s32_s19, %s3532_s22  ;;  %p3538_p2 = scmp.lt.s32.totalorder %s3532_s22, %s3532_s22 }
   0x8   :  { %p3539_p3 = por %p3538_p2, %p3537_p1 }
   0xa   :  { %p3540_p4 = pnand %p3539_p3, %p3533_p0 }
   0xc   :  { %3543 = shalt.err (!%p3540_p4)
}
   0xd   :  { %s3634_s23 = smov 256   ;;  %s3635_s24 = smov 16  }
   0xe   :  { %37 = dma.hbm_to_vmem [thread:$0]  %s3802_s1, 16384, %s32_s19, [#allocation6], %s3634_s23, %s3634_s23, %s3635_s24  }
   0xf   :  { %s3552_s27 = scalar_lea.vmem %s20_s21, 1024  ;;  %p3557_p6 = scmp.lt.s32.totalorder %s20_s21, %s20_s21 }
  0x10   :  { %p3553_p5 = scmp.ne.s32.totalorder %s20_s21, %s3552_s27  ;;  %p3558_p7 = scmp.lt.s32.totalorder %s3552_s27, %s3552_s27 }
  0x12   :  { %p3559_p8 = por %p3558_p7, %p3557_p6 }
  0x14   :  { %p3560_p9 = pnand %p3559_p8, %p3553_p5 }
  0x16   :  { %3563 = shalt.err (!%p3560_p9)
}
  0x17   :  { %25 = dma.hbm_to_vmem [thread:$0]  %s3801_s0, 1024, %s20_s21, [#allocation3], %s3634_s23, %s3634_s23, %s3635_s24  }
  0x18   :  { %s3636_s30 = smov [#allocation7]   ;;  %s3637_s7 = smov [#allocation8]  }
  0x19   :  { %s44_s6 = sshll.u32 %s3636_s30, 4  ;;  %s53_s8 = sshll.u32 %s3637_s7, 4  ;;  %s45_s6 = int_to_ptr.vmem [resolvable:$true] %s44_s6  ;;  %s54_s8 = int_to_ptr.vmem [resolvable:$true] %s53_s8 }
  0x1a   :  { %s3572_s9 = scalar_lea.vmem %s45_s6, 64  ;;  %p3577_p11 = scmp.lt.s32.totalorder %s45_s6, %s45_s6 }
  0x1b   :  { %p3573_p10 = scmp.ne.s32.totalorder %s45_s6, %s3572_s9  ;;  %p3578_p12 = scmp.lt.s32.totalorder %s3572_s9, %s3572_s9 }
  0x1d   :  { %p3579_p13 = por %p3578_p12, %p3577_p11 }
  0x1f   :  { %p3580_p0 = pnand %p3579_p13, %p3573_p10 }
  0x21   :  { %3583 = shalt.err (!%p3580_p0)
}
  0x22   :  { %47 = dma.hbm_to_vmem [thread:$0]  %s3803_s2, 64, %s45_s6, [#allocation6]  }
  0x23   :  { %s3592_s11 = scalar_lea.vmem %s54_s8, 24576  ;;  %p3597_p2 = scmp.lt.s32.totalorder %s54_s8, %s54_s8 }
  0x24   :  { %p3593_p1 = scmp.ne.s32.totalorder %s54_s8, %s3592_s11  ;;  %p3598_p3 = scmp.lt.s32.totalorder %s3592_s11, %s3592_s11 }
  0x26   :  { %p3599_p4 = por %p3598_p3, %p3597_p2 }
  0x28   :  { %p3600_p5 = pnand %p3599_p4, %p3593_p1 }
  0x2a   :  { %3603 = shalt.err (!%p3600_p5)
}
  0x2b   :  { %s3638_s0 = smov 384   ;;  %s3639_s12 = smov 24  }
  0x2c   :  { %59 = dma.hbm_to_vmem [thread:$0]  %s3804_s3, 24576, %s54_s8, [#allocation9], %s3638_s0, %s3638_s0, %s3639_s12  }
  0x2d   :  { %3624 = dma.done.wait [#allocation3], 1024  }
  0x2e   :  { %3625 = vsyncadd [#allocation3], 4294966272 }
  0x2f   :  { %3626 = dma.done.wait [#allocation6], 16448  }
  0x30   :  { %3627 = vsyncadd [#allocation6], 4294950848 }
  0x31   :  { %3628 = dma.done.wait [#allocation9], 24576  }
  0x32   :  { %3629 = vsyncadd [#allocation9], 4294942720  ;;  %v3032_v0 = vld [vmem:[#allocation5 + $0xe4] ss:$16 sps:$4 sm:$0xff]   ;;  %v3036_v2 = vld [vmem:[#allocation5 + $0xe0] ss:$16 sps:$4 sm:$0xff]  }
  0x33   :  { %v3034_v1 = vld [vmem:[#allocation5 + $0x2e4] ss:$16 sps:$4 sm:$0xff]   ;;  %912 = vmatprep.subr.bf16.mxu0 %v3032_v0  ;;  %v3037_v3 = vld [vmem:[#allocation5 + $0x2e0] ss:$16 sps:$4 sm:$0xff]   ;;  %v3687_v51 = vld [vmem:[#allocation2 + $0xc] ss:$16 sps:$4 sm:$0xff]  }
  0x34   :  { %965 = vmatprep.subr.bf16.mxu1 %v3034_v1  ;;  %v3038_v4 = vld [vmem:[#allocation5 + $0xc4] ss:$16 sps:$4 sm:$0xff]   ;;  %913 = vmatpush1.bf16.msra.mxu0 %v3036_v2  ;;  %v3042_v6 = vld [vmem:[#allocation5 + $0xc0] ss:$16 sps:$4 sm:$0xff]   ;;  %v3136_v2 = vld [vmem:[#allocation5 + $0xec] ss:$16 sps:$4 sm:$0xff]  }
  0x35   :  { %966 = vmatpush1.bf16.msra.mxu1 %v3037_v3  ;;  %v3040_v5 = vld [vmem:[#allocation5 + $0x2c4] ss:$16 sps:$4 sm:$0xff]   ;;  %914 = vmatprep.subr.bf16.mxu0 %v3038_v4  ;;  %v3043_v7 = vld [vmem:[#allocation5 + $0x2c0] ss:$16 sps:$4 sm:$0xff]   ;;  %v3139_v3 = vld [vmem:[#allocation5 + $0x2ec] ss:$16 sps:$4 sm:$0xff]  }
  0x36   :  { %967 = vmatprep.subr.bf16.mxu1 %v3040_v5  ;;  %v3044_v8 = vld [vmem:[#allocation5 + $0xa4] ss:$16 sps:$4 sm:$0xff]   ;;  %v3048_v10 = vld [vmem:[#allocation5 + $0xa0] ss:$16 sps:$4 sm:$0xff]   ;;  %997 = vmatprep.mubr.bf16.mxu1 %v3687_v51  ;;  %v3693_v5 = vld [vmem:[#allocation2 + $0x8] ss:$16 sps:$4 sm:$0xff]  }
  0x37   :  { %v3046_v9 = vld [vmem:[#allocation5 + $0x2a4] ss:$16 sps:$4 sm:$0xff]   ;;  %v3049_v11 = vld [vmem:[#allocation5 + $0x2a0] ss:$16 sps:$4 sm:$0xff]  }
  0x38   :  { %915 = vmatpush1.bf16.msra.mxu0 %v3042_v6  ;;  %v3050_v12 = vld [vmem:[#allocation5 + $0x84] ss:$16 sps:$4 sm:$0xff]   ;;  %v3054_v14 = vld [vmem:[#allocation5 + $0x80] ss:$16 sps:$4 sm:$0xff]   ;;  %v3134_v6 = vld [vmem:[#allocation5 + $0xe8] ss:$16 sps:$4 sm:$0xff]  }
  0x39   :  { %968 = vmatpush1.bf16.msra.mxu1 %v3043_v7  ;;  %916 = vmatprep.subr.bf16.mxu0 %v3044_v8  ;;  %v3052_v13 = vld [vmem:[#allocation5 + $0x284] ss:$16 sps:$4 sm:$0xff]   ;;  %v3055_v15 = vld [vmem:[#allocation5 + $0x280] ss:$16 sps:$4 sm:$0xff]   ;;  %v3137_v7 = vld [vmem:[#allocation5 + $0x2e8] ss:$16 sps:$4 sm:$0xff]  }
  0x3a   :  { %969 = vmatprep.subr.bf16.mxu1 %v3046_v9  ;;  %v3056_v16 = vld [vmem:[#allocation5 + $0x64] ss:$16 sps:$4 sm:$0xff]   ;;  %v3060_v18 = vld [vmem:[#allocation5 + $0x60] ss:$16 sps:$4 sm:$0xff]   ;;  %v3142_v8 = vld [vmem:[#allocation5 + $0xcc] ss:$16 sps:$4 sm:$0xff]  }
  0x3b   :  { %v3058_v17 = vld [vmem:[#allocation5 + $0x264] ss:$16 sps:$4 sm:$0xff]   ;;  %v3061_v19 = vld [vmem:[#allocation5 + $0x260] ss:$16 sps:$4 sm:$0xff]   ;;  %v3145_v9 = vld [vmem:[#allocation5 + $0x2cc] ss:$16 sps:$4 sm:$0xff]  }
  0x3c   :  { %917 = vmatpush1.bf16.msra.mxu0 %v3048_v10  ;;  %v3062_v20 = vld [vmem:[#allocation5 + $0x44] ss:$16 sps:$4 sm:$0xff]   ;;  %v3066_v22 = vld [vmem:[#allocation5 + $0x40] ss:$16 sps:$4 sm:$0xff]  }
  0x3d   :  { %970 = vmatpush1.bf16.msra.mxu1 %v3049_v11  ;;  %918 = vmatprep.subr.bf16.mxu0 %v3050_v12  ;;  %v3064_v21 = vld [vmem:[#allocation5 + $0x244] ss:$16 sps:$4 sm:$0xff]   ;;  %v3067_v23 = vld [vmem:[#allocation5 + $0x240] ss:$16 sps:$4 sm:$0xff]   ;;  %v3697_v11 = vld [vmem:[#allocation2 + $0x2c] ss:$16 sps:$4 sm:$0xff]  }
  0x3e   :  { %971 = vmatprep.subr.bf16.mxu1 %v3052_v13  ;;  %v3068_v24 = vld [vmem:[#allocation5 + $0x24] ss:$16 sps:$4 sm:$0xff]   ;;  %v3072_v26 = vld [vmem:[#allocation5 + $0x20] ss:$16 sps:$4 sm:$0xff]   ;;  %v3140_v12 = vld [vmem:[#allocation5 + $0xc8] ss:$16 sps:$4 sm:$0xff]  }
  0x3f   :  { %v3070_v25 = vld [vmem:[#allocation5 + $0x224] ss:$16 sps:$4 sm:$0xff]   ;;  %v3073_v27 = vld [vmem:[#allocation5 + $0x220] ss:$16 sps:$4 sm:$0xff]   ;;  %v3143_v13 = vld [vmem:[#allocation5 + $0x2c8] ss:$16 sps:$4 sm:$0xff]  }
  0x40   :  { %919 = vmatpush1.bf16.msra.mxu0 %v3054_v14  ;;  %v3074_v28 = vld [vmem:[#allocation5 + $0x4] ss:$16 sps:$4 sm:$0xff]   ;;  %v3078_v30 = vld [vmem:[#allocation5] ss:$16 sps:$4 sm:$0xff]   ;;  %v3151_v14 = vld [vmem:[#allocation5 + $0xac] ss:$16 sps:$4 sm:$0xff]  }
  0x41   :  { %972 = vmatpush1.bf16.msra.mxu1 %v3055_v15  ;;  %920 = vmatprep.subr.bf16.mxu0 %v3056_v16  ;;  %v3076_v29 = vld [vmem:[#allocation5 + $0x204] ss:$16 sps:$4 sm:$0xff]   ;;  %v3079_v31 = vld [vmem:[#allocation5 + $0x200] ss:$16 sps:$4 sm:$0xff]   ;;  %v3154_v15 = vld [vmem:[#allocation5 + $0x2ac] ss:$16 sps:$4 sm:$0xff]  }
  0x42   :  { %973 = vmatprep.subr.bf16.mxu1 %v3058_v17  ;;  %v3080_v32 = vld [vmem:[#allocation5 + $0x1e4] ss:$16 sps:$4 sm:$0xff]   ;;  %v3084_v34 = vld [vmem:[#allocation5 + $0x1e0] ss:$16 sps:$4 sm:$0xff]   ;;  %v3149_v17 = vld [vmem:[#allocation5 + $0xa8] ss:$16 sps:$4 sm:$0xff]  }
  0x43   :  { %v3082_v33 = vld [vmem:[#allocation5 + $0x3e4] ss:$16 sps:$4 sm:$0xff]   ;;  %v3085_v35 = vld [vmem:[#allocation5 + $0x3e0] ss:$16 sps:$4 sm:$0xff]  }
  0x44   :  { %921 = vmatpush1.bf16.msra.mxu0 %v3060_v18  ;;  %v3086_v36 = vld [vmem:[#allocation5 + $0x1c4] ss:$16 sps:$4 sm:$0xff]   ;;  %v3090_v38 = vld [vmem:[#allocation5 + $0x1c0] ss:$16 sps:$4 sm:$0xff]   ;;  %v3152_v18 = vld [vmem:[#allocation5 + $0x2a8] ss:$16 sps:$4 sm:$0xff]  }
  0x45   :  { %974 = vmatpush1.bf16.msra.mxu1 %v3061_v19  ;;  %922 = vmatprep.subr.bf16.mxu0 %v3062_v20  ;;  %v3088_v37 = vld [vmem:[#allocation5 + $0x3c4] ss:$16 sps:$4 sm:$0xff]   ;;  %v3091_v39 = vld [vmem:[#allocation5 + $0x3c0] ss:$16 sps:$4 sm:$0xff]   ;;  %v3705_v19 = vld [vmem:[#allocation2 + $0x28] ss:$16 sps:$4 sm:$0xff]  }
  0x46   :  { %975 = vmatprep.subr.bf16.mxu1 %v3064_v21  ;;  %v3092_v40 = vld [vmem:[#allocation5 + $0x1a4] ss:$16 sps:$4 sm:$0xff]   ;;  %v3096_v42 = vld [vmem:[#allocation5 + $0x1a0] ss:$16 sps:$4 sm:$0xff]   ;;  %v3160_v20 = vld [vmem:[#allocation5 + $0x8c] ss:$16 sps:$4 sm:$0xff]  }
  0x47   :  { %v3094_v41 = vld [vmem:[#allocation5 + $0x3a4] ss:$16 sps:$4 sm:$0xff]   ;;  %v3097_v43 = vld [vmem:[#allocation5 + $0x3a0] ss:$16 sps:$4 sm:$0xff]   ;;  %v3163_v21 = vld [vmem:[#allocation5 + $0x28c] ss:$16 sps:$4 sm:$0xff]  }
  0x48   :  { %923 = vmatpush1.bf16.msra.mxu0 %v3066_v22  ;;  %v3098_v44 = vld [vmem:[#allocation5 + $0x184] ss:$16 sps:$4 sm:$0xff]   ;;  %v3102_v46 = vld [vmem:[#allocation5 + $0x180] ss:$16 sps:$4 sm:$0xff]   ;;  %v3158_v22 = vld [vmem:[#allocation5 + $0x88] ss:$16 sps:$4 sm:$0xff]  }
  0x49   :  { %976 = vmatpush1.bf16.msra.mxu1 %v3067_v23  ;;  %924 = vmatprep.subr.bf16.mxu0 %v3068_v24  ;;  %v3100_v45 = vld [vmem:[#allocation5 + $0x384] ss:$16 sps:$4 sm:$0xff]   ;;  %v3103_v47 = vld [vmem:[#allocation5 + $0x380] ss:$16 sps:$4 sm:$0xff]   ;;  %v3161_v23 = vld [vmem:[#allocation5 + $0x288] ss:$16 sps:$4 sm:$0xff]  }
  0x4a   :  { %977 = vmatprep.subr.bf16.mxu1 %v3070_v25  ;;  %v3104_v48 = vld [vmem:[#allocation5 + $0x164] ss:$16 sps:$4 sm:$0xff]   ;;  %v3108_v52 = vld [vmem:[#allocation5 + $0x160] ss:$16 sps:$4 sm:$0xff]   ;;  %v3166_v24 = vld [vmem:[#allocation5 + $0x6c] ss:$16 sps:$4 sm:$0xff]  }
  0x4b   :  { %v3685_v49 = vld [vmem:[#allocation2 + $0x4] ss:$16 sps:$4 sm:$0xff]   ;;  %v3109_v53 = vld [vmem:[#allocation5 + $0x360] ss:$16 sps:$4 sm:$0xff]   ;;  %v3169_v25 = vld [vmem:[#allocation5 + $0x26c] ss:$16 sps:$4 sm:$0xff]  }
  0x4c   :  { %925 = vmatpush1.bf16.msra.mxu0 %v3072_v26  ;;  %v3106_v50 = vld [vmem:[#allocation5 + $0x364] ss:$16 sps:$4 sm:$0xff]   ;;  %944 = vmatprep.mubr.bf16.mxu0 %v3685_v49  ;;  %v3114_v56 = vld [vmem:[#allocation5 + $0x140] ss:$16 sps:$4 sm:$0xff]   ;;  %v3164_v26 = vld [vmem:[#allocation5 + $0x68] ss:$16 sps:$4 sm:$0xff]  }
  0x4d   :  { %978 = vmatpush1.bf16.msra.mxu1 %v3073_v27  ;;  %926 = vmatprep.subr.bf16.mxu0 %v3074_v28  ;;  %v3110_v54 = vld [vmem:[#allocation5 + $0x144] ss:$16 sps:$4 sm:$0xff]   ;;  %v3115_v57 = vld [vmem:[#allocation5 + $0x340] ss:$16 sps:$4 sm:$0xff]   ;;  %v3167_v27 = vld [vmem:[#allocation5 + $0x268] ss:$16 sps:$4 sm:$0xff]  }
  0x4e   :  { %979 = vmatprep.subr.bf16.mxu1 %v3076_v29  ;;  %v3112_v55 = vld [vmem:[#allocation5 + $0x344] ss:$16 sps:$4 sm:$0xff]   ;;  %v3120_v60 = vld [vmem:[#allocation5 + $0x120] ss:$16 sps:$4 sm:$0xff]   ;;  %v3172_v28 = vld [vmem:[#allocation5 + $0x4c] ss:$16 sps:$4 sm:$0xff]  }
  0x4f   :  { %v3116_v58 = vld [vmem:[#allocation5 + $0x124] ss:$16 sps:$4 sm:$0xff]   ;;  %v3121_v61 = vld [vmem:[#allocation5 + $0x320] ss:$16 sps:$4 sm:$0xff]   ;;  %v3175_v29 = vld [vmem:[#allocation5 + $0x24c] ss:$16 sps:$4 sm:$0xff]  }
  0x50   :  { %927 = vmatpush1.bf16.msra.mxu0 %v3078_v30  ;;  %v3118_v59 = vld [vmem:[#allocation5 + $0x324] ss:$16 sps:$4 sm:$0xff]   ;;  %v3126_v0 = vld [vmem:[#allocation5 + $0x100] ss:$16 sps:$4 sm:$0xff]   ;;  %v3170_v30 = vld [vmem:[#allocation5 + $0x48] ss:$16 sps:$4 sm:$0xff]  }
  0x51   :  { %980 = vmatpush1.bf16.msra.mxu1 %v3079_v31  ;;  %928 = vmatprep.subr.bf16.mxu0 %v3080_v32  ;;  %v3122_v62 = vld [vmem:[#allocation5 + $0x104] ss:$16 sps:$4 sm:$0xff]   ;;  %v3127_v1 = vld [vmem:[#allocation5 + $0x300] ss:$16 sps:$4 sm:$0xff]   ;;  %v3173_v31 = vld [vmem:[#allocation5 + $0x248] ss:$16 sps:$4 sm:$0xff]  }
  0x52   :  { %981 = vmatprep.subr.bf16.mxu1 %v3082_v33  ;;  %v3124_v63 = vld [vmem:[#allocation5 + $0x304] ss:$16 sps:$4 sm:$0xff]   ;;  %v3691_v4 = vld [vmem:[#allocation2] ss:$16 sps:$4 sm:$0xff]   ;;  %v3178_v32 = vld [vmem:[#allocation5 + $0x2c] ss:$16 sps:$4 sm:$0xff]  }
  0x53   :  { %v3695_v10 = vld [vmem:[#allocation2 + $0x24] ss:$16 sps:$4 sm:$0xff]   ;;  %v3702_v16 = vld [vmem:[#allocation2 + $0x20] ss:$16 sps:$4 sm:$0xff]   ;;  %v3181_v33 = vld [vmem:[#allocation5 + $0x22c] ss:$16 sps:$4 sm:$0xff]  }
  0x54   :  { %929 = vmatpush2.bf16.msra.mxu0 %v3084_v34  ;;  %v3176_v34 = vld [vmem:[#allocation5 + $0x28] ss:$16 sps:$4 sm:$0xff]  }
  0x55   :  { %982 = vmatpush2.bf16.msra.mxu1 %v3085_v35  ;;  %930 = vmatprep.subr.bf16.mxu0 %v3086_v36  ;;  %v3179_v35 = vld [vmem:[#allocation5 + $0x228] ss:$16 sps:$4 sm:$0xff]   ;;  %v3184_v36 = vld [vmem:[#allocation5 + $0xc] ss:$16 sps:$4 sm:$0xff]  }
  0x56   :  { %983 = vmatprep.subr.bf16.mxu1 %v3088_v37  ;;  %v3187_v37 = vld [vmem:[#allocation5 + $0x20c] ss:$16 sps:$4 sm:$0xff]  }
  0x58   :  { %931 = vmatpush2.bf16.msra.mxu0 %v3090_v38  ;;  %v3182_v38 = vld [vmem:[#allocation5 + $0x8] ss:$16 sps:$4 sm:$0xff]  }
  0x59   :  { %984 = vmatpush2.bf16.msra.mxu1 %v3091_v39  ;;  %932 = vmatprep.subr.bf16.mxu0 %v3092_v40  ;;  %v3185_v39 = vld [vmem:[#allocation5 + $0x208] ss:$16 sps:$4 sm:$0xff]   ;;  %v3190_v40 = vld [vmem:[#allocation5 + $0x1ec] ss:$16 sps:$4 sm:$0xff]  }
  0x5a   :  { %985 = vmatprep.subr.bf16.mxu1 %v3094_v41  ;;  %v3193_v41 = vld [vmem:[#allocation5 + $0x3ec] ss:$16 sps:$4 sm:$0xff]  }
  0x5c   :  { %933 = vmatpush2.bf16.msra.mxu0 %v3096_v42  ;;  %v3188_v42 = vld [vmem:[#allocation5 + $0x1e8] ss:$16 sps:$4 sm:$0xff]  }
  0x5d   :  { %986 = vmatpush2.bf16.msra.mxu1 %v3097_v43  ;;  %934 = vmatprep.subr.bf16.mxu0 %v3098_v44  ;;  %v3191_v43 = vld [vmem:[#allocation5 + $0x3e8] ss:$16 sps:$4 sm:$0xff]   ;;  %v3196_v44 = vld [vmem:[#allocation5 + $0x1cc] ss:$16 sps:$4 sm:$0xff]  }
  0x5e   :  { %987 = vmatprep.subr.bf16.mxu1 %v3100_v45  ;;  %v3199_v45 = vld [vmem:[#allocation5 + $0x3cc] ss:$16 sps:$4 sm:$0xff]  }
  0x60   :  { %935 = vmatpush2.bf16.msra.mxu0 %v3102_v46  ;;  %v3194_v46 = vld [vmem:[#allocation5 + $0x1c8] ss:$16 sps:$4 sm:$0xff]  }
  0x61   :  { %988 = vmatpush2.bf16.msra.mxu1 %v3103_v47  ;;  %936 = vmatprep.subr.bf16.mxu0 %v3104_v48  ;;  %v3197_v47 = vld [vmem:[#allocation5 + $0x3c8] ss:$16 sps:$4 sm:$0xff]   ;;  %v3202_v48 = vld [vmem:[#allocation5 + $0x1ac] ss:$16 sps:$4 sm:$0xff]  }
  0x62   :  { %989 = vmatprep.subr.bf16.mxu1 %v3106_v50  ;;  %v3200_v50 = vld [vmem:[#allocation5 + $0x1a8] ss:$16 sps:$4 sm:$0xff]  }
  0x64   :  { %937 = vmatpush2.bf16.msra.mxu0 %v3108_v52  ;;  %v3208_v52 = vld [vmem:[#allocation5 + $0x18c] ss:$16 sps:$4 sm:$0xff]  }
  0x65   :  { %990 = vmatpush2.bf16.msra.mxu1 %v3109_v53  ;;  %938 = vmatprep.subr.bf16.mxu0 %v3110_v54  ;;  %v3211_v53 = vld [vmem:[#allocation5 + $0x38c] ss:$16 sps:$4 sm:$0xff]   ;;  %v3206_v54 = vld [vmem:[#allocation5 + $0x188] ss:$16 sps:$4 sm:$0xff]  }
  0x66   :  { %991 = vmatprep.subr.bf16.mxu1 %v3112_v55  ;;  %v3209_v55 = vld [vmem:[#allocation5 + $0x388] ss:$16 sps:$4 sm:$0xff]  }
  0x68   :  { %939 = vmatpush2.bf16.msra.mxu0 %v3114_v56  ;;  %v3214_v56 = vld [vmem:[#allocation5 + $0x16c] ss:$16 sps:$4 sm:$0xff]  }
  0x69   :  { %992 = vmatpush2.bf16.msra.mxu1 %v3115_v57  ;;  %940 = vmatprep.subr.bf16.mxu0 %v3116_v58  ;;  %v3217_v57 = vld [vmem:[#allocation5 + $0x36c] ss:$16 sps:$4 sm:$0xff]   ;;  %v3212_v58 = vld [vmem:[#allocation5 + $0x168] ss:$16 sps:$4 sm:$0xff]  }
  0x6a   :  { %993 = vmatprep.subr.bf16.mxu1 %v3118_v59  ;;  %v3215_v59 = vld [vmem:[#allocation5 + $0x368] ss:$16 sps:$4 sm:$0xff]  }
  0x6c   :  { %941 = vmatpush2.bf16.msra.mxu0 %v3120_v60  ;;  %v3220_v60 = vld [vmem:[#allocation5 + $0x14c] ss:$16 sps:$4 sm:$0xff]  }
  0x6d   :  { %994 = vmatpush2.bf16.msra.mxu1 %v3121_v61  ;;  %942 = vmatprep.subr.bf16.mxu0 %v3122_v62  ;;  %v3223_v61 = vld [vmem:[#allocation5 + $0x34c] ss:$16 sps:$4 sm:$0xff]   ;;  %v3218_v62 = vld [vmem:[#allocation5 + $0x148] ss:$16 sps:$4 sm:$0xff]  }
  0x6e   :  { %995 = vmatprep.subr.bf16.mxu1 %v3124_v63  ;;  %v3221_v63 = vld [vmem:[#allocation5 + $0x348] ss:$16 sps:$4 sm:$0xff]  }
  0x70   :  { %943 = vmatpush2.bf16.msra.mxu0 %v3126_v0  ;;  %v3226_v0 = vld [vmem:[#allocation5 + $0x12c] ss:$16 sps:$4 sm:$0xff]  }
  0x71   :  { %996 = vmatpush2.bf16.msra.mxu1 %v3127_v1  ;;  %1018 = vmatprep.subr.bf16.mxu0 %v3136_v2  ;;  %v3229_v1 = vld [vmem:[#allocation5 + $0x32c] ss:$16 sps:$4 sm:$0xff]   ;;  %v3224_v2 = vld [vmem:[#allocation5 + $0x128] ss:$16 sps:$4 sm:$0xff]  }
  0x72   :  { %1071 = vmatprep.subr.bf16.mxu1 %v3139_v3  ;;  %v3227_v3 = vld [vmem:[#allocation5 + $0x328] ss:$16 sps:$4 sm:$0xff]  }
  0x73   :  { %945 = vmatmul.mubr.bf16.vlgmr.msra.gmra.mxu0 %v3691_v4 }
  0x74   :  { %998 = vmatmul.mubr.bf16.vlgmr.msra.gmra.mxu1 %v3693_v5  ;;  %1019 = vmatpush1.bf16.msra.mxu0 %v3134_v6  ;;  %v3232_v6 = vld [vmem:[#allocation5 + $0x10c] ss:$16 sps:$4 sm:$0xff]  }
  0x75   :  { %1072 = vmatpush1.bf16.msra.mxu1 %v3137_v7  ;;  %1020 = vmatprep.subr.bf16.mxu0 %v3142_v8  ;;  %v3235_v7 = vld [vmem:[#allocation5 + $0x30c] ss:$16 sps:$4 sm:$0xff]   ;;  %v3230_v8 = vld [vmem:[#allocation5 + $0x108] ss:$16 sps:$4 sm:$0xff]  }
  0x76   :  { %1073 = vmatprep.subr.bf16.mxu1 %v3145_v9  ;;  %954 = vmatprep.mubr.bf16.mxu0 %v3695_v10  ;;  %v3233_v9 = vld [vmem:[#allocation5 + $0x308] ss:$16 sps:$4 sm:$0xff]  }
  0x77   :  { %1007 = vmatprep.mubr.bf16.mxu1 %v3697_v11 }
  0x78   :  { %1021 = vmatpush1.bf16.msra.mxu0 %v3140_v12  ;;  %v3238_v12 = vld [vmem:[#allocation8 + $0x154] ss:$24 sps:$4 sm:$0xff]  }
  0x79   :  { %1074 = vmatpush1.bf16.msra.mxu1 %v3143_v13  ;;  %1022 = vmatprep.subr.bf16.mxu0 %v3151_v14  ;;  %v3236_v13 = vld [vmem:[#allocation8 + $0x150] ss:$24 sps:$4 sm:$0xff]   ;;  %v3241_v14 = vld [vmem:[#allocation8 + $0x124] ss:$24 sps:$4 sm:$0xff]  }
  0x7a   :  { %1075 = vmatprep.subr.bf16.mxu1 %v3154_v15  ;;  %v3239_v15 = vld [vmem:[#allocation8 + $0x120] ss:$24 sps:$4 sm:$0xff]  }
  0x7b   :  { %955 = vmatmul.mubr.bf16.gmra.mxu0 %v3702_v16 }
  0x7c   :  { %1008 = vmatmul.mubr.bf16.gmra.mxu1 %v3705_v19  ;;  %1023 = vmatpush1.bf16.msra.mxu0 %v3149_v17  ;;  %v3244_v17 = vld [vmem:[#allocation8 + $0xf4] ss:$24 sps:$4 sm:$0xff]  }
  0x7d   :  { %1076 = vmatpush1.bf16.msra.mxu1 %v3152_v18  ;;  %1024 = vmatprep.subr.bf16.mxu0 %v3160_v20  ;;  %v3242_v18 = vld [vmem:[#allocation8 + $0xf0] ss:$24 sps:$4 sm:$0xff]   ;;  %v3247_v20 = vld [vmem:[#allocation8 + $0xc4] ss:$24 sps:$4 sm:$0xff]  }
  0x7e   :  { %1077 = vmatprep.subr.bf16.mxu1 %v3163_v21  ;;  %1050 = vmatprep.mubr.bf16.mxu0 %v3685_v49  ;;  %v3205_v49 = vld [vmem:[#allocation5 + $0x3ac] ss:$16 sps:$4 sm:$0xff]  }
  0x7f   :  { %1103 = vmatprep.mubr.bf16.mxu1 %v3687_v51  ;;  %v3203_v51 = vld [vmem:[#allocation5 + $0x3a8] ss:$16 sps:$4 sm:$0xff]   ;;  %v3245_v21 = vld [vmem:[#allocation8 + $0xc0] ss:$24 sps:$4 sm:$0xff]  }
  0x80   :  { %1025 = vmatpush1.bf16.msra.mxu0 %v3158_v22  ;;  %v3284_v22 = vld [vmem:[#allocation8 + $0x450] ss:$24 sps:$4 sm:$0xff]  }
  0x81   :  { %1078 = vmatpush1.bf16.msra.mxu1 %v3161_v23  ;;  %1026 = vmatprep.subr.bf16.mxu0 %v3166_v24  ;;  %v3251_v23 = vld [vmem:[#allocation8 + $0x60] ss:$24 sps:$4 sm:$0xff]   ;;  %v3292_v24 = vld [vmem:[#allocation8 + $0x424] ss:$24 sps:$4 sm:$0xff]  }
  0x82   :  { %1079 = vmatprep.subr.bf16.mxu1 %v3169_v25  ;;  %v3256_v25 = vld [vmem:[#allocation8 + $0x34] ss:$24 sps:$4 sm:$0xff]  }
  0x84   :  { %1027 = vmatpush1.bf16.msra.mxu0 %v3164_v26  ;;  %v3298_v26 = vld [vmem:[#allocation8 + $0x3f4] ss:$24 sps:$4 sm:$0xff]  }
  0x85   :  { %1080 = vmatpush1.bf16.msra.mxu1 %v3167_v27  ;;  %1028 = vmatprep.subr.bf16.mxu0 %v3172_v28  ;;  %v3259_v27 = vld [vmem:[#allocation8 + $0x4] ss:$24 sps:$4 sm:$0xff]   ;;  %v3296_v28 = vld [vmem:[#allocation8 + $0x3f0] ss:$24 sps:$4 sm:$0xff]  }
  0x86   :  { %1081 = vmatprep.subr.bf16.mxu1 %v3175_v29  ;;  %v3257_v29 = vld [vmem:[#allocation8] ss:$24 sps:$4 sm:$0xff]  }
  0x88   :  { %1029 = vmatpush1.bf16.msra.mxu0 %v3170_v30  ;;  %v3302_v30 = vld [vmem:[#allocation8 + $0x3c0] ss:$24 sps:$4 sm:$0xff]  }
  0x89   :  { %1082 = vmatpush1.bf16.msra.mxu1 %v3173_v31  ;;  %1030 = vmatprep.subr.bf16.mxu0 %v3178_v32  ;;  %v3304_v31 = vld [vmem:[#allocation8 + $0x3c4] ss:$24 sps:$4 sm:$0xff]   ;;  %v3262_v32 = vld [vmem:[#allocation8 + $0x2d4] ss:$24 sps:$4 sm:$0xff]  }
  0x8a   :  { %1083 = vmatprep.subr.bf16.mxu1 %v3181_v33  ;;  %v3260_v33 = vld [vmem:[#allocation8 + $0x2d0] ss:$24 sps:$4 sm:$0xff]  }
  0x8c   :  { %1031 = vmatpush1.bf16.msra.mxu0 %v3176_v34  ;;  %v3308_v34 = vld [vmem:[#allocation8 + $0x390] ss:$24 sps:$4 sm:$0xff]  }
  0x8d   :  { %1084 = vmatpush1.bf16.msra.mxu1 %v3179_v35  ;;  %1032 = vmatprep.subr.bf16.mxu0 %v3184_v36  ;;  %v3310_v35 = vld [vmem:[#allocation8 + $0x394] ss:$24 sps:$4 sm:$0xff]   ;;  %v3265_v36 = vld [vmem:[#allocation8 + $0x2a4] ss:$24 sps:$4 sm:$0xff]  }
  0x8e   :  { %1085 = vmatprep.subr.bf16.mxu1 %v3187_v37  ;;  %v3263_v37 = vld [vmem:[#allocation8 + $0x2a0] ss:$24 sps:$4 sm:$0xff]  }
  0x90   :  { %1033 = vmatpush1.bf16.msra.mxu0 %v3182_v38  ;;  %v3314_v38 = vld [vmem:[#allocation8 + $0x360] ss:$24 sps:$4 sm:$0xff]  }
  0x91   :  { %1086 = vmatpush1.bf16.msra.mxu1 %v3185_v39  ;;  %1034 = vmatprep.subr.bf16.mxu0 %v3190_v40  ;;  %v3316_v39 = vld [vmem:[#allocation8 + $0x364] ss:$24 sps:$4 sm:$0xff]   ;;  %v3268_v40 = vld [vmem:[#allocation8 + $0x274] ss:$24 sps:$4 sm:$0xff]  }
  0x92   :  { %1087 = vmatprep.subr.bf16.mxu1 %v3193_v41  ;;  %v3266_v41 = vld [vmem:[#allocation8 + $0x270] ss:$24 sps:$4 sm:$0xff]  }
  0x94   :  { %1035 = vmatpush2.bf16.msra.mxu0 %v3188_v42  ;;  %v3320_v42 = vld [vmem:[#allocation8 + $0x330] ss:$24 sps:$4 sm:$0xff]  }
  0x95   :  { %1088 = vmatpush2.bf16.msra.mxu1 %v3191_v43  ;;  %1036 = vmatprep.subr.bf16.mxu0 %v3196_v44  ;;  %v3322_v43 = vld [vmem:[#allocation8 + $0x334] ss:$24 sps:$4 sm:$0xff]   ;;  %v3271_v44 = vld [vmem:[#allocation8 + $0x244] ss:$24 sps:$4 sm:$0xff]  }
  0x96   :  { %1089 = vmatprep.subr.bf16.mxu1 %v3199_v45  ;;  %v3269_v45 = vld [vmem:[#allocation8 + $0x240] ss:$24 sps:$4 sm:$0xff]  }
  0x98   :  { %1037 = vmatpush2.bf16.msra.mxu0 %v3194_v46  ;;  %v3326_v46 = vld [vmem:[#allocation8 + $0x300] ss:$24 sps:$4 sm:$0xff]  }
  0x99   :  { %1090 = vmatpush2.bf16.msra.mxu1 %v3197_v47  ;;  %1038 = vmatprep.subr.bf16.mxu0 %v3202_v48  ;;  %v3328_v47 = vld [vmem:[#allocation8 + $0x304] ss:$24 sps:$4 sm:$0xff]   ;;  %v3274_v48 = vld [vmem:[#allocation8 + $0x214] ss:$24 sps:$4 sm:$0xff]  }
  0x9a   :  { %1091 = vmatprep.subr.bf16.mxu1 %v3205_v49  ;;  %v3332_v49 = vld [vmem:[#allocation8 + $0x5d0] ss:$24 sps:$4 sm:$0xff]  }
  0x9c   :  { %1039 = vmatpush2.bf16.msra.mxu0 %v3200_v50  ;;  %v3334_v50 = vld [vmem:[#allocation8 + $0x5d4] ss:$24 sps:$4 sm:$0xff]  }
  0x9d   :  { %1092 = vmatpush2.bf16.msra.mxu1 %v3203_v51  ;;  %1040 = vmatprep.subr.bf16.mxu0 %v3208_v52  ;;  %v3272_v51 = vld [vmem:[#allocation8 + $0x210] ss:$24 sps:$4 sm:$0xff]   ;;  %v3277_v52 = vld [vmem:[#allocation8 + $0x1e4] ss:$24 sps:$4 sm:$0xff]  }
  0x9e   :  { %1093 = vmatprep.subr.bf16.mxu1 %v3211_v53  ;;  %v3338_v53 = vld [vmem:[#allocation8 + $0x5a0] ss:$24 sps:$4 sm:$0xff]  }
  0xa0   :  { %1041 = vmatpush2.bf16.msra.mxu0 %v3206_v54  ;;  %v3340_v54 = vld [vmem:[#allocation8 + $0x5a4] ss:$24 sps:$4 sm:$0xff]  }
  0xa1   :  { %1094 = vmatpush2.bf16.msra.mxu1 %v3209_v55  ;;  %1042 = vmatprep.subr.bf16.mxu0 %v3214_v56  ;;  %v3275_v55 = vld [vmem:[#allocation8 + $0x1e0] ss:$24 sps:$4 sm:$0xff]   ;;  %v3280_v56 = vld [vmem:[#allocation8 + $0x1b4] ss:$24 sps:$4 sm:$0xff]  }
  0xa2   :  { %1095 = vmatprep.subr.bf16.mxu1 %v3217_v57  ;;  %v3344_v57 = vld [vmem:[#allocation8 + $0x570] ss:$24 sps:$4 sm:$0xff]  }
  0xa4   :  { %1043 = vmatpush2.bf16.msra.mxu0 %v3212_v58  ;;  %v3346_v58 = vld [vmem:[#allocation8 + $0x574] ss:$24 sps:$4 sm:$0xff]  }
  0xa5   :  { %1096 = vmatpush2.bf16.msra.mxu1 %v3215_v59  ;;  %1044 = vmatprep.subr.bf16.mxu0 %v3220_v60  ;;  %v3278_v59 = vld [vmem:[#allocation8 + $0x1b0] ss:$24 sps:$4 sm:$0xff]   ;;  %v3283_v60 = vld [vmem:[#allocation8 + $0x184] ss:$24 sps:$4 sm:$0xff]  }
  0xa6   :  { %1097 = vmatprep.subr.bf16.mxu1 %v3223_v61  ;;  %v3350_v61 = vld [vmem:[#allocation8 + $0x540] ss:$24 sps:$4 sm:$0xff]  }
  0xa8   :  { %1045 = vmatpush2.bf16.msra.mxu0 %v3218_v62  ;;  %v3352_v62 = vld [vmem:[#allocation8 + $0x544] ss:$24 sps:$4 sm:$0xff]  }
  0xa9   :  { %1098 = vmatpush2.bf16.msra.mxu1 %v3221_v63  ;;  %1046 = vmatprep.subr.bf16.mxu0 %v3226_v0  ;;  %v3281_v63 = vld [vmem:[#allocation8 + $0x180] ss:$24 sps:$4 sm:$0xff]   ;;  %v3289_v0 = vld [vmem:[#allocation8 + $0x15c] ss:$24 sps:$4 sm:$0xff]  }
  0xaa   :  { %1099 = vmatprep.subr.bf16.mxu1 %v3229_v1  ;;  %v3356_v1 = vld [vmem:[#allocation8 + $0x510] ss:$24 sps:$4 sm:$0xff]  }
  0xac   :  { %1047 = vmatpush2.bf16.msra.mxu0 %v3224_v2  ;;  %v3358_v2 = vld [vmem:[#allocation8 + $0x514] ss:$24 sps:$4 sm:$0xff]  }
  0xad   :  { %1100 = vmatpush2.bf16.msra.mxu1 %v3227_v3  ;;  %1048 = vmatprep.subr.bf16.mxu0 %v3232_v6  ;;  %v3364_v3 = vld [vmem:[#allocation8 + $0x4e4] ss:$24 sps:$4 sm:$0xff]   ;;  %v3362_v6 = vld [vmem:[#allocation8 + $0x4e0] ss:$24 sps:$4 sm:$0xff]  }
  0xae   :  { %1101 = vmatprep.subr.bf16.mxu1 %v3235_v7  ;;  %v3370_v7 = vld [vmem:[#allocation8 + $0x4b4] ss:$24 sps:$4 sm:$0xff]  }
  0xb0   :  { %1049 = vmatpush2.bf16.msra.mxu0 %v3230_v8  ;;  %v3368_v8 = vld [vmem:[#allocation8 + $0x4b0] ss:$24 sps:$4 sm:$0xff]  }
  0xb1   :  { %1102 = vmatpush2.bf16.msra.mxu1 %v3233_v9  ;;  %2332 = vmatprep.subr.bf16.mxu0 %v3238_v12  ;;  %v3376_v9 = vld [vmem:[#allocation8 + $0x484] ss:$24 sps:$4 sm:$0xff]   ;;  %v3374_v12 = vld [vmem:[#allocation8 + $0x480] ss:$24 sps:$4 sm:$0xff]  }
  0xb3   :  { %1051 = vmatmul.mubr.bf16.vlgmr.msra.gmra.mxu0 %v3691_v4  ;;  %v3250_v4 = vld [vmem:[#allocation8 + $0x94] ss:$24 sps:$4 sm:$0xff]  }
  0xb4   :  { %1104 = vmatmul.mubr.bf16.vlgmr.msra.gmra.mxu1 %v3693_v5  ;;  %1060 = vmatprep.mubr.bf16.mxu0 %v3695_v10  ;;  %v3248_v5 = vld [vmem:[#allocation8 + $0x90] ss:$24 sps:$4 sm:$0xff]   ;;  %v3286_v10 = vld [vmem:[#allocation8 + $0x454] ss:$24 sps:$4 sm:$0xff]  }
  0xb5   :  { %1113 = vmatprep.mubr.bf16.mxu1 %v3697_v11  ;;  %2333 = vmatpush1.bf16.msra.mxu0 %v3236_v13  ;;  %v3253_v11 = vld [vmem:[#allocation8 + $0x64] ss:$24 sps:$4 sm:$0xff]  }
  0xb6   :  { %2334 = vmatprep.subr.bf16.mxu0 %v3241_v14  ;;  %2385 = vmatprep.subr.bf16.mxu1 %v3286_v10  ;;  %v3382_v13 = vld [vmem:[#allocation8 + $0x45c] ss:$24 sps:$4 sm:$0xff]   ;;  %v212_v14 = vlaneseq }
  0xb7   :  { %2386 = vmatpush1.bf16.msra.mxu1 %v3284_v22 }
  0xb8   :  { %2387 = vmatprep.subr.bf16.mxu1 %v3292_v24 }
  0xb9   :  { %2335 = vmatpush1.bf16.msra.mxu0 %v3239_v15  ;;  %v3717_v15 = vshrl.u32 %v212_v14, 7  ;;  %v3331_v14 = vld [vmem:[#allocation8 + $0xc] ss:$24 sps:$4 sm:$0xff]  }
  0xba   :  { %2336 = vmatprep.subr.bf16.mxu0 %v3244_v17 }
  0xbb   :  { %1061 = vmatmul.mubr.bf16.gmra.mxu0 %v3702_v16  ;;  %v3290_v16 = vld [vmem:[#allocation8 + $0x420] ss:$24 sps:$4 sm:$0xff]   ;;  %v218_v17 = vsub.s32 1, %v3717_v15 }
  0xbc   :  { %1114 = vmatmul.mubr.bf16.gmra.mxu1 %v3705_v19  ;;  %v3254_v19 = vld [vmem:[#allocation8 + $0x30] ss:$24 sps:$4 sm:$0xff]  }
  0xbd   :  { %2337 = vmatpush1.bf16.msra.mxu0 %v3242_v18  ;;  %2388 = vmatpush1.bf16.msra.mxu1 %v3290_v16  ;;  %v3720_v18 = vld [vmem:[#allocation7] sm:$0xf] }
  0xbe   :  { %2338 = vmatprep.subr.bf16.mxu0 %v3247_v20  ;;  %2389 = vmatprep.subr.bf16.mxu1 %v3298_v26  ;;  %v214_v20 = vsub.s32 0, %v3717_v15 }
  0xc1   :  { %2339 = vmatpush1.bf16.msra.mxu0 %v3245_v21  ;;  %2390 = vmatpush1.bf16.msra.mxu1 %v3296_v28  ;;  %v219_v21 = vrot.slane %v3720_v18, %v218_v17 }
  0xc2   :  { %2340 = vmatprep.subr.bf16.mxu0 %v3250_v4  ;;  %2391 = vmatprep.subr.bf16.mxu1 %v3304_v31  ;;  %v215_v4 = vrot.slane %v3720_v18, %v214_v20 }
  0xc5   :  { %2341 = vmatpush1.bf16.msra.mxu0 %v3248_v5  ;;  %2392 = vmatpush1.bf16.msra.mxu1 %v3302_v30 }
  0xc6   :  { %2342 = vmatprep.subr.bf16.mxu0 %v3253_v11  ;;  %2393 = vmatprep.subr.bf16.mxu1 %v3310_v35 }
  0xc9   :  { %2343 = vmatpush1.bf16.msra.mxu0 %v3251_v23  ;;  %2394 = vmatpush1.bf16.msra.mxu1 %v3308_v34 }
  0xca   :  { %2344 = vmatprep.subr.bf16.mxu0 %v3256_v25  ;;  %2395 = vmatprep.subr.bf16.mxu1 %v3316_v39 }
  0xcd   :  { %2345 = vmatpush1.bf16.msra.mxu0 %v3254_v19  ;;  %2396 = vmatpush1.bf16.msra.mxu1 %v3314_v38 }
  0xce   :  { %2346 = vmatprep.subr.bf16.mxu0 %v3259_v27  ;;  %2397 = vmatprep.subr.bf16.mxu1 %v3322_v43 }
  0xd1   :  { %2347 = vmatpush1.bf16.msra.mxu0 %v3257_v29  ;;  %2398 = vmatpush1.bf16.msra.mxu1 %v3320_v42 }
  0xd2   :  { %2348 = vmatprep.subr.bf16.mxu0 %v3262_v32  ;;  %2399 = vmatprep.subr.bf16.mxu1 %v3328_v47 }
  0xd5   :  { %2349 = vmatpush2.bf16.msra.mxu0 %v3260_v33  ;;  %2400 = vmatpush1.bf16.msra.mxu1 %v3326_v46 }
  0xd6   :  { %2350 = vmatprep.subr.bf16.mxu0 %v3265_v36  ;;  %2401 = vmatprep.subr.bf16.mxu1 %v3334_v50 }
  0xd9   :  { %2351 = vmatpush2.bf16.msra.mxu0 %v3263_v37  ;;  %2402 = vmatpush2.bf16.msra.mxu1 %v3332_v49  ;;  %v3287_v49 = vld [vmem:[#allocation8 + $0x158] ss:$24 sps:$4 sm:$0xff]  }
  0xda   :  { %2352 = vmatprep.subr.bf16.mxu0 %v3268_v40  ;;  %2403 = vmatprep.subr.bf16.mxu1 %v3340_v54 }
  0xdd   :  { %2353 = vmatpush2.bf16.msra.mxu0 %v3266_v41  ;;  %2404 = vmatpush2.bf16.msra.mxu1 %v3338_v53  ;;  %v3295_v53 = vld [vmem:[#allocation8 + $0x12c] ss:$24 sps:$4 sm:$0xff]  }
  0xde   :  { %2354 = vmatprep.subr.bf16.mxu0 %v3271_v44  ;;  %2405 = vmatprep.subr.bf16.mxu1 %v3346_v58 }
  0xe1   :  { %2355 = vmatpush2.bf16.msra.mxu0 %v3269_v45  ;;  %2406 = vmatpush2.bf16.msra.mxu1 %v3344_v57 }
  0xe2   :  { %2356 = vmatprep.subr.bf16.mxu0 %v3274_v48  ;;  %2407 = vmatprep.subr.bf16.mxu1 %v3352_v62 }
  0xe5   :  { %2357 = vmatpush2.bf16.msra.mxu0 %v3272_v51  ;;  %2408 = vmatpush2.bf16.msra.mxu1 %v3350_v61  ;;  %v3301_v61 = vld [vmem:[#allocation8 + $0xfc] ss:$24 sps:$4 sm:$0xff]  }
  0xe6   :  { %2358 = vmatprep.subr.bf16.mxu0 %v3277_v52  ;;  %2409 = vmatprep.subr.bf16.mxu1 %v3358_v2  ;;  %v3307_v2 = vld [vmem:[#allocation8 + $0xcc] ss:$24 sps:$4 sm:$0xff]  }
  0xe9   :  { %2359 = vmatpush2.bf16.msra.mxu0 %v3275_v55  ;;  %2410 = vmatpush2.bf16.msra.mxu1 %v3356_v1  ;;  %v3299_v1 = vld [vmem:[#allocation8 + $0xf8] ss:$24 sps:$4 sm:$0xff]  }
  0xea   :  { %2360 = vmatprep.subr.bf16.mxu0 %v3280_v56  ;;  %2411 = vmatprep.subr.bf16.mxu1 %v3364_v3  ;;  %v3305_v3 = vld [vmem:[#allocation8 + $0xc8] ss:$24 sps:$4 sm:$0xff]  }
  0xed   :  { %2361 = vmatpush2.bf16.msra.mxu0 %v3278_v59  ;;  %2412 = vmatpush2.bf16.msra.mxu1 %v3362_v6  ;;  %v3313_v6 = vld [vmem:[#allocation8 + $0x9c] ss:$24 sps:$4 sm:$0xff]  }
  0xee   :  { %2362 = vmatprep.subr.bf16.mxu0 %v3283_v60  ;;  %2413 = vmatprep.subr.bf16.mxu1 %v3370_v7  ;;  %v3293_v60 = vld [vmem:[#allocation8 + $0x128] ss:$24 sps:$4 sm:$0xff]   ;;  %v3311_v7 = vld [vmem:[#allocation8 + $0x98] ss:$24 sps:$4 sm:$0xff]  }
  0xf1   :  { %2363 = vmatpush2.bf16.msra.mxu0 %v3281_v63  ;;  %2414 = vmatpush2.bf16.msra.mxu1 %v3368_v8  ;;  %v3319_v8 = vld [vmem:[#allocation8 + $0x6c] ss:$24 sps:$4 sm:$0xff]  }
  0xf2   :  { %2438 = vmatprep.subr.bf16.mxu0 %v3289_v0  ;;  %2415 = vmatprep.subr.bf16.mxu1 %v3376_v9  ;;  %v3317_v9 = vld [vmem:[#allocation8 + $0x68] ss:$24 sps:$4 sm:$0xff]  }
  0xf5   :  { %2416 = vmatpush2.bf16.msra.mxu1 %v3374_v12  ;;  %v3325_v12 = vld [vmem:[#allocation8 + $0x3c] ss:$24 sps:$4 sm:$0xff]  }
  0xf6   :  { %2491 = vmatprep.subr.bf16.mxu1 %v3382_v13  ;;  %v3323_v13 = vld [vmem:[#allocation8 + $0x38] ss:$24 sps:$4 sm:$0xff]  }
 0x133   :  { %v946_v5 = vpop.f32.mrf.mxu0 }
 0x134   :  { %v999_v10 = vpop.f32.mrf.mxu1  ;;  %v947_v24 = vadd.f32 %v946_v5, %v215_v4  ;;  %v3335_v5 = vld [vmem:[#allocation8 + $0x2d8] ss:$24 sps:$4 sm:$0xff]  }
 0x135   :  { %v948_v11 = vpop.f32.mrf.mxu0 }
 0x136   :  { %v1001_v22 = vpop.f32.mrf.mxu1  ;;  %v949_v23 = vadd.f32 %v948_v11, %v219_v21  ;;  %v1000_v31 = vadd.f32 %v999_v10, %v947_v24  ;;  %v3343_v10 = vld [vmem:[#allocation8 + $0x2ac] ss:$24 sps:$4 sm:$0xff]   ;;  %v3341_v11 = vld [vmem:[#allocation8 + $0x2a8] ss:$24 sps:$4 sm:$0xff]  }
 0x137   :  { %v950_v25 = vpop.f32.mrf.mxu0  ;;  %v3355_v24 = vld [vmem:[#allocation8 + $0x24c] ss:$24 sps:$4 sm:$0xff]  }
 0x138   :  { %v1003_v16 = vpop.f32.mrf.mxu1  ;;  %v951_v19 = vadd.f32 %v950_v25, %v215_v4  ;;  %v1002_v28 = vadd.f32 %v1001_v22, %v949_v23  ;;  %v1124_v42 = vmax.f32 %v1000_v31, 0.0  ;;  %v3349_v22 = vld [vmem:[#allocation8 + $0x27c] ss:$24 sps:$4 sm:$0xff]   ;;  %v3347_v23 = vld [vmem:[#allocation8 + $0x278] ss:$24 sps:$4 sm:$0xff]  }
 0x139   :  { %v952_v26 = vpop.f32.mrf.mxu0  ;;  %v3353_v25 = vld [vmem:[#allocation8 + $0x248] ss:$24 sps:$4 sm:$0xff]  }
 0x13a   :  { %v1005_v27 = vpop.f32.mrf.mxu1  ;;  %v1004_v29 = vadd.f32 %v1003_v16, %v951_v19  ;;  %v953_v30 = vadd.f32 %v952_v26, %v219_v21  ;;  %v1125_v39 = vmax.f32 %v1002_v28, 0.0  ;;  %v3361_v16 = vld [vmem:[#allocation8 + $0x21c] ss:$24 sps:$4 sm:$0xff]   ;;  %v226_v19 = vsub.s32 3, %v3717_v15  ;;  %v3367_v28 = vld [vmem:[#allocation8 + $0x1ec] ss:$24 sps:$4 sm:$0xff]  }
 0x13b   :  { %v956_v32 = vpop.f32.mrf.mxu0  ;;  %v222_v26 = vsub.s32 2, %v3717_v15 }
 0x13c   :  { %v1009_v33 = vpop.f32.mrf.mxu1  ;;  %v1006_v34 = vadd.f32 %v1005_v27, %v953_v30  ;;  %v957_v35 = vadd.f32 %v956_v32, %v215_v4  ;;  %v1128_v36 = vmax.f32 %v1004_v29, 0.0  ;;  %v3359_v27 = vld [vmem:[#allocation8 + $0x218] ss:$24 sps:$4 sm:$0xff]   ;;  %v227_v29 = vrot.slane %v3720_v18, %v226_v19 }
 0x13d   :  { %v958_v37 = vpop.f32.mrf.mxu0  ;;  %v223_v30 = vrot.slane %v3720_v18, %v222_v26 }
 0x13e   :  { %v1011_v38 = vpop.f32.mrf.mxu1  ;;  %v1129_v40 = vmax.f32 %v1006_v34, 0.0  ;;  %v959_v41 = vadd.f32 %v958_v37, %v219_v21  ;;  %v1010_v43 = vadd.f32 %v1009_v33, %v957_v35  ;;  %v3731_v50 = vpack.c.bf16 %v1128_v36, %v1124_v42  ;;  %v3365_v33 = vld [vmem:[#allocation8 + $0x1e8] ss:$24 sps:$4 sm:$0xff]   ;;  %v3373_v36 = vld [vmem:[#allocation8 + $0x1bc] ss:$24 sps:$4 sm:$0xff]  }
 0x13f   :  { %v960_v44 = vpop.f32.mrf.mxu0  ;;  %v3371_v42 = vld [vmem:[#allocation8 + $0x1b8] ss:$24 sps:$4 sm:$0xff]  }
 0x140   :  { %v1013_v45 = vpop.f32.mrf.mxu1  ;;  %v3729_v46 = vpack.c.bf16 %v1129_v40, %v1125_v39  ;;  %v961_v47 = vadd.f32 %v960_v44, %v215_v4  ;;  %v1012_v48 = vadd.f32 %v1011_v38, %v959_v41  ;;  %v1132_v56 = vmax.f32 %v1010_v43, 0.0  ;;  %v3337_v4 = vld [vmem:[#allocation8 + $0x2dc] ss:$24 sps:$4 sm:$0xff]  }
 0x141   :  { %v962_v51 = vpop.f32.mrf.mxu0 }
 0x142   :  { %v1015_v52 = vpop.f32.mrf.mxu1  ;;  %v963_v54 = vadd.f32 %v962_v51, %v219_v21  ;;  %v1014_v55 = vadd.f32 %v1013_v45, %v961_v47  ;;  %2364 = vmatprep.mubr.bf16.mxu0 %v3729_v46  ;;  %v1133_v57 = vmax.f32 %v1012_v48, 0.0  ;;  %v3329_v21 = vld [vmem:[#allocation8 + $0x8] ss:$24 sps:$4 sm:$0xff]   ;;  %v3379_v45 = vld [vmem:[#allocation8 + $0x18c] ss:$24 sps:$4 sm:$0xff]  }
 0x143   :  { %2365 = vmatmul.mubr.bf16.vlgmr.msra.gmra.mxu0 %v3731_v50 }
 0x144   :  { %v1136_v58 = vmax.f32 %v1014_v55, 0.0  ;;  %v1016_v59 = vadd.f32 %v1015_v52, %v963_v54  ;;  %2439 = vmatpush1.bf16.msra.mxu0 %v3287_v49  ;;  %v3377_v55 = vld [vmem:[#allocation8 + $0x188] ss:$24 sps:$4 sm:$0xff]  }
 0x145   :  { %2440 = vmatprep.subr.bf16.mxu0 %v3295_v53 }
 0x146   :  { %v1137_v62 = vmax.f32 %v1016_v59, 0.0  ;;  %v3735_v63 = vpack.c.bf16 %v1136_v58, %v1132_v56  ;;  %v3385_v59 = vld [vmem:[#allocation8 + $0x164] ss:$24 sps:$4 sm:$0xff]  }
 0x148   :  { %v3737_v0 = vpack.c.bf16 %v1137_v62, %v1133_v57  ;;  %2441 = vmatpush1.bf16.msra.mxu0 %v3293_v60 }
 0x149   :  { %2442 = vmatprep.subr.bf16.mxu0 %v3301_v61 }
 0x14a   :  { %2374 = vmatprep.mubr.bf16.mxu0 %v3737_v0 }
 0x14b   :  { %2375 = vmatmul.mubr.bf16.gmra.mxu0 %v3735_v63 }
 0x14c   :  { %2443 = vmatpush1.bf16.msra.mxu0 %v3299_v1  ;;  %2470 = vmatprep.mubr.bf16.mxu0 %v3729_v46 }
 0x14d   :  { %2444 = vmatprep.subr.bf16.mxu0 %v3307_v2 }
 0x150   :  { %2445 = vmatpush1.bf16.msra.mxu0 %v3305_v3 }
 0x151   :  { %2446 = vmatprep.subr.bf16.mxu0 %v3313_v6 }
 0x154   :  { %2447 = vmatpush1.bf16.msra.mxu0 %v3311_v7 }
 0x155   :  { %2448 = vmatprep.subr.bf16.mxu0 %v3319_v8 }
 0x158   :  { %2449 = vmatpush1.bf16.msra.mxu0 %v3317_v9 }
 0x159   :  { %2450 = vmatprep.subr.bf16.mxu0 %v3325_v12  ;;  %v3380_v12 = vld [vmem:[#allocation8 + $0x458] ss:$24 sps:$4 sm:$0xff]  }
 0x15c   :  { %2451 = vmatpush1.bf16.msra.mxu0 %v3323_v13 }
 0x15d   :  { %2452 = vmatprep.subr.bf16.mxu0 %v3331_v14 }
 0x160   :  { %2453 = vmatpush1.bf16.msra.mxu0 %v3329_v21  ;;  %v3383_v21 = vld [vmem:[#allocation8 + $0x160] ss:$24 sps:$4 sm:$0xff]  }
 0x161   :  { %2454 = vmatprep.subr.bf16.mxu0 %v3337_v4 }
 0x164   :  { %2455 = vmatpush2.bf16.msra.mxu0 %v3335_v5  ;;  %v3388_v5 = vld [vmem:[#allocation8 + $0x42c] ss:$24 sps:$4 sm:$0xff]  }
 0x165   :  { %2456 = vmatprep.subr.bf16.mxu0 %v3343_v10 }
 0x168   :  { %2457 = vmatpush2.bf16.msra.mxu0 %v3341_v11 }
 0x169   :  { %2458 = vmatprep.subr.bf16.mxu0 %v3349_v22  ;;  %v3391_v22 = vld [vmem:[#allocation8 + $0x134] ss:$24 sps:$4 sm:$0xff]  }
 0x16c   :  { %2459 = vmatpush2.bf16.msra.mxu0 %v3347_v23 }
 0x16d   :  { %2460 = vmatprep.subr.bf16.mxu0 %v3355_v24 }
 0x170   :  { %2461 = vmatpush2.bf16.msra.mxu0 %v3353_v25 }
 0x171   :  { %2462 = vmatprep.subr.bf16.mxu0 %v3361_v16 }
 0x173   :  { %v1052_v31 = vpop.f32.mrf.mxu0 }
 0x174   :  { %v1105_v32 = vpop.f32.mrf.mxu1  ;;  %2463 = vmatpush2.bf16.msra.mxu0 %v3359_v27  ;;  %v1053_v38 = vadd.f32 %v1052_v31, %v223_v30  ;;  %v3386_v27 = vld [vmem:[#allocation8 + $0x428] ss:$24 sps:$4 sm:$0xff]   ;;  %v3397_v31 = vld [vmem:[#allocation8 + $0x104] ss:$24 sps:$4 sm:$0xff]  }
 0x175   :  { %v1054_v34 = vpop.f32.mrf.mxu0  ;;  %2464 = vmatprep.subr.bf16.mxu0 %v3367_v28  ;;  %v3389_v28 = vld [vmem:[#allocation8 + $0x130] ss:$24 sps:$4 sm:$0xff]  }
 0x176   :  { %v1107_v35 = vpop.f32.mrf.mxu1  ;;  %v1055_v37 = vadd.f32 %v1054_v34, %v227_v29  ;;  %v1106_v49 = vadd.f32 %v1105_v32, %v1053_v38  ;;  %v3392_v34 = vld [vmem:[#allocation8 + $0x3f8] ss:$24 sps:$4 sm:$0xff]   ;;  %v3398_v38 = vld [vmem:[#allocation8 + $0x3c8] ss:$24 sps:$4 sm:$0xff]  }
 0x177   :  { %v1056_v39 = vpop.f32.mrf.mxu0 }
 0x178   :  { %v1109_v40 = vpop.f32.mrf.mxu1  ;;  %v1057_v41 = vadd.f32 %v1056_v39, %v223_v30  ;;  %2465 = vmatpush2.bf16.msra.mxu0 %v3365_v33  ;;  %v1108_v18 = vadd.f32 %v1107_v35, %v1055_v37  ;;  %v1126_v1 = vmax.f32 %v1106_v49, 0.0  ;;  %v3395_v35 = vld [vmem:[#allocation8 + $0x100] ss:$24 sps:$4 sm:$0xff]   ;;  %v3403_v37 = vld [vmem:[#allocation8 + $0xd4] ss:$24 sps:$4 sm:$0xff]  }
 0x179   :  { %v1058_v43 = vpop.f32.mrf.mxu0  ;;  %2466 = vmatprep.subr.bf16.mxu0 %v3373_v36  ;;  %v3400_v36 = vld [vmem:[#allocation8 + $0x3cc] ss:$24 sps:$4 sm:$0xff]   ;;  %v3401_v39 = vld [vmem:[#allocation8 + $0xd0] ss:$24 sps:$4 sm:$0xff]  }
 0x17a   :  { %v1111_v44 = vpop.f32.mrf.mxu1  ;;  %v1110_v47 = vadd.f32 %v1109_v40, %v1057_v41  ;;  %v1059_v48 = vadd.f32 %v1058_v43, %v227_v29  ;;  %v1127_v60 = vmax.f32 %v1108_v18, 0.0  ;;  %v3406_v40 = vld [vmem:[#allocation8 + $0x39c] ss:$24 sps:$4 sm:$0xff]   ;;  %v3407_v43 = vld [vmem:[#allocation8 + $0xa0] ss:$24 sps:$4 sm:$0xff]  }
 0x17b   :  { %v1062_v51 = vpop.f32.mrf.mxu0  ;;  %v3409_v41 = vld [vmem:[#allocation8 + $0xa4] ss:$24 sps:$4 sm:$0xff]   ;;  %v3410_v18 = vld [vmem:[#allocation8 + $0x368] ss:$24 sps:$4 sm:$0xff]   ;;  %v3416_v49 = vld [vmem:[#allocation8 + $0x338] ss:$24 sps:$4 sm:$0xff]  }
 0x17c   :  { %v1115_v52 = vpop.f32.mrf.mxu1  ;;  %v1112_v53 = vadd.f32 %v1111_v44, %v1059_v48  ;;  %v1063_v54 = vadd.f32 %v1062_v51, %v223_v30  ;;  %2467 = vmatpush2.bf16.msra.mxu0 %v3371_v42  ;;  %v1130_v56 = vmax.f32 %v1110_v47, 0.0  ;;  %v3404_v42 = vld [vmem:[#allocation8 + $0x398] ss:$24 sps:$4 sm:$0xff]   ;;  %v3412_v44 = vld [vmem:[#allocation8 + $0x36c] ss:$24 sps:$4 sm:$0xff]  }
 0x17d   :  { %v1064_v57 = vpop.f32.mrf.mxu0  ;;  %2468 = vmatprep.subr.bf16.mxu0 %v3379_v45  ;;  %v3415_v45 = vld [vmem:[#allocation8 + $0x74] ss:$24 sps:$4 sm:$0xff]   ;;  %v3421_v48 = vld [vmem:[#allocation8 + $0x44] ss:$24 sps:$4 sm:$0xff]   ;;  %v3419_v51 = vld [vmem:[#allocation8 + $0x40] ss:$24 sps:$4 sm:$0xff]  }
 0x17e   :  { %v1117_v58 = vpop.f32.mrf.mxu1  ;;  %v1131_v61 = vmax.f32 %v1112_v53, 0.0  ;;  %v1065_v62 = vadd.f32 %v1064_v57, %v227_v29  ;;  %v1116_v2 = vadd.f32 %v1115_v52, %v1063_v54  ;;  %v3752_v13 = vpack.c.bf16 %v1130_v56, %v1126_v1  ;;  %v3418_v47 = vld [vmem:[#allocation8 + $0x33c] ss:$24 sps:$4 sm:$0xff]   ;;  %v3424_v52 = vld [vmem:[#allocation8 + $0x30c] ss:$24 sps:$4 sm:$0xff]  }
 0x17f   :  { %v1066_v3 = vpop.f32.mrf.mxu0  ;;  %v3427_v53 = vld [vmem:[#allocation8 + $0x14] ss:$24 sps:$4 sm:$0xff]   ;;  %v3422_v54 = vld [vmem:[#allocation8 + $0x308] ss:$24 sps:$4 sm:$0xff]   ;;  %v3433_v57 = vld [vmem:[#allocation8 + $0x2e4] ss:$24 sps:$4 sm:$0xff]  }
 0x180   :  { %v1119_v6 = vpop.f32.mrf.mxu1  ;;  %v3750_v7 = vpack.c.bf16 %v1131_v61, %v1127_v60  ;;  %v1067_v8 = vadd.f32 %v1066_v3, %v223_v30  ;;  %v1118_v9 = vadd.f32 %v1117_v58, %v1065_v62  ;;  %2469 = vmatpush2.bf16.msra.mxu0 %v3377_v55  ;;  %v1134_v23 = vmax.f32 %v1116_v2, 0.0  ;;  %v3425_v55 = vld [vmem:[#allocation8 + $0x10] ss:$24 sps:$4 sm:$0xff]   ;;  %v3430_v56 = vld [vmem:[#allocation8 + $0x5dc] ss:$24 sps:$4 sm:$0xff]  }
 0x181   :  { %v1068_v14 = vpop.f32.mrf.mxu0  ;;  %2544 = vmatprep.subr.bf16.mxu0 %v3385_v59  ;;  %v3428_v58 = vld [vmem:[#allocation8 + $0x5d8] ss:$24 sps:$4 sm:$0xff]   ;;  %v3436_v60 = vld [vmem:[#allocation8 + $0x5ac] ss:$24 sps:$4 sm:$0xff]   ;;  %v3434_v62 = vld [vmem:[#allocation8 + $0x5a8] ss:$24 sps:$4 sm:$0xff]  }
 0x182   :  { %v1121_v4 = vpop.f32.mrf.mxu1  ;;  %v1069_v10 = vadd.f32 %v1068_v14, %v227_v29  ;;  %v1120_v11 = vadd.f32 %v1119_v6, %v1067_v8  ;;  %2417 = vmatprep.mubr.bf16.mxu1 %v3750_v7  ;;  %v1135_v24 = vmax.f32 %v1118_v9, 0.0  ;;  %v3394_v29 = vld [vmem:[#allocation8 + $0x3fc] ss:$24 sps:$4 sm:$0xff]   ;;  %v3431_v59 = vld [vmem:[#allocation8 + $0x2e0] ss:$24 sps:$4 sm:$0xff]  }
 0x183   :  { %2471 = vmatmul.mubr.bf16.vlgmr.msra.gmra.mxu0 %v3731_v50  ;;  %2418 = vmatmul.mubr.bf16.vlgmr.msra.gmra.mxu1 %v3752_v13  ;;  %v3439_v61 = vld [vmem:[#allocation8 + $0x2b4] ss:$24 sps:$4 sm:$0xff]   ;;  %v3437_v1 = vld [vmem:[#allocation8 + $0x2b0] ss:$24 sps:$4 sm:$0xff]   ;;  %v3445_v3 = vld [vmem:[#allocation8 + $0x284] ss:$24 sps:$4 sm:$0xff]  }
 0x184   :  { %v1138_v25 = vmax.f32 %v1120_v11, 0.0  ;;  %v1122_v16 = vadd.f32 %v1121_v4, %v1069_v10  ;;  %2480 = vmatprep.mubr.bf16.mxu0 %v3737_v0  ;;  %2492 = vmatpush1.bf16.msra.mxu1 %v3380_v12  ;;  %v3442_v2 = vld [vmem:[#allocation8 + $0x57c] ss:$24 sps:$4 sm:$0xff]   ;;  %v3440_v6 = vld [vmem:[#allocation8 + $0x578] ss:$24 sps:$4 sm:$0xff]  }
 0x185   :  { %2545 = vmatpush1.bf16.msra.mxu0 %v3383_v21  ;;  %2493 = vmatprep.subr.bf16.mxu1 %v3388_v5  ;;  %v3443_v8 = vld [vmem:[#allocation8 + $0x280] ss:$24 sps:$4 sm:$0xff]   ;;  %v3448_v9 = vld [vmem:[#allocation8 + $0x54c] ss:$24 sps:$4 sm:$0xff]   ;;  %v3449_v21 = vld [vmem:[#allocation8 + $0x250] ss:$24 sps:$4 sm:$0xff]  }
 0x186   :  { %v1139_v30 = vmax.f32 %v1122_v16, 0.0  ;;  %2546 = vmatprep.subr.bf16.mxu0 %v3391_v22  ;;  %v3758_v32 = vpack.c.bf16 %v1138_v25, %v1134_v23  ;;  %v3451_v12 = vld [vmem:[#allocation8 + $0x254] ss:$24 sps:$4 sm:$0xff]   ;;  %v3446_v14 = vld [vmem:[#allocation8 + $0x548] ss:$24 sps:$4 sm:$0xff]  }
 0x187   :  { %v3454_v4 = vld [vmem:[#allocation8 + $0x51c] ss:$24 sps:$4 sm:$0xff]   ;;  %v3452_v10 = vld [vmem:[#allocation8 + $0x518] ss:$24 sps:$4 sm:$0xff]   ;;  %v3460_v22 = vld [vmem:[#allocation8 + $0x4ec] ss:$24 sps:$4 sm:$0xff]  }
 0x188   :  { %v3760_v33 = vpack.c.bf16 %v1139_v30, %v1135_v24  ;;  %2494 = vmatpush1.bf16.msra.mxu1 %v3386_v27  ;;  %v3457_v5 = vld [vmem:[#allocation8 + $0x224] ss:$24 sps:$4 sm:$0xff]   ;;  %v3455_v11 = vld [vmem:[#allocation8 + $0x220] ss:$24 sps:$4 sm:$0xff]   ;;  %v3463_v23 = vld [vmem:[#allocation8 + $0x1f4] ss:$24 sps:$4 sm:$0xff]  }
 0x189   :  { %2547 = vmatpush1.bf16.msra.mxu0 %v3389_v28  ;;  %2495 = vmatprep.subr.bf16.mxu1 %v3394_v29  ;;  %v3458_v24 = vld [vmem:[#allocation8 + $0x4e8] ss:$24 sps:$4 sm:$0xff]   ;;  %v3466_v16 = vld [vmem:[#allocation8 + $0x4bc] ss:$24 sps:$4 sm:$0xff]   ;;  %v3464_v28 = vld [vmem:[#allocation8 + $0x4b8] ss:$24 sps:$4 sm:$0xff]  }
 0x18a   :  { %2427 = vmatprep.mubr.bf16.mxu1 %v3760_v33  ;;  %2548 = vmatprep.subr.bf16.mxu0 %v3397_v31  ;;  %v3461_v25 = vld [vmem:[#allocation8 + $0x1f0] ss:$24 sps:$4 sm:$0xff]   ;;  %v3469_v27 = vld [vmem:[#allocation8 + $0x1c4] ss:$24 sps:$4 sm:$0xff]   ;;  %v3467_v29 = vld [vmem:[#allocation8 + $0x1c0] ss:$24 sps:$4 sm:$0xff]  }
 0x18b   :  { %2481 = vmatmul.mubr.bf16.gmra.mxu0 %v3735_v63  ;;  %2428 = vmatmul.mubr.bf16.gmra.mxu1 %v3758_v32  ;;  %v3472_v30 = vld [vmem:[#allocation8 + $0x48c] ss:$24 sps:$4 sm:$0xff]  }
 0x18c   :  { %2496 = vmatpush1.bf16.msra.mxu1 %v3392_v34  ;;  %2576 = vmatprep.mubr.bf16.mxu0 %v3729_v46  ;;  %v3413_v46 = vld [vmem:[#allocation8 + $0x70] ss:$24 sps:$4 sm:$0xff]   ;;  %v3475_v31 = vld [vmem:[#allocation8 + $0x194] ss:$24 sps:$4 sm:$0xff]  }
 0x18d   :  { %2549 = vmatpush1.bf16.msra.mxu0 %v3395_v35  ;;  %2523 = vmatprep.mubr.bf16.mxu1 %v3750_v7  ;;  %v3470_v34 = vld [vmem:[#allocation8 + $0x488] ss:$24 sps:$4 sm:$0xff]  }
 0x18e   :  { %2497 = vmatprep.subr.bf16.mxu1 %v3400_v36  ;;  %2550 = vmatprep.subr.bf16.mxu0 %v3403_v37  ;;  %v3473_v35 = vld [vmem:[#allocation8 + $0x190] ss:$24 sps:$4 sm:$0xff]   ;;  %v3478_v36 = vld [vmem:[#allocation8 + $0x464] ss:$24 sps:$4 sm:$0xff]   ;;  %v3476_v37 = vld [vmem:[#allocation8 + $0x460] ss:$24 sps:$4 sm:$0xff]  }
 0x190   :  { %2498 = vmatpush1.bf16.msra.mxu1 %v3398_v38  ;;  %v3481_v38 = vld [vmem:[#allocation8 + $0x434] ss:$24 sps:$4 sm:$0xff]  }
 0x191   :  { %2551 = vmatpush1.bf16.msra.mxu0 %v3401_v39  ;;  %2499 = vmatprep.subr.bf16.mxu1 %v3406_v40  ;;  %v3479_v39 = vld [vmem:[#allocation8 + $0x430] ss:$24 sps:$4 sm:$0xff]   ;;  %v3484_v40 = vld [vmem:[#allocation8 + $0x404] ss:$24 sps:$4 sm:$0xff]  }
 0x192   :  { %2552 = vmatprep.subr.bf16.mxu0 %v3409_v41  ;;  %v3482_v41 = vld [vmem:[#allocation8 + $0x400] ss:$24 sps:$4 sm:$0xff]  }
 0x194   :  { %2500 = vmatpush1.bf16.msra.mxu1 %v3404_v42  ;;  %v3487_v42 = vld [vmem:[#allocation8 + $0x3d4] ss:$24 sps:$4 sm:$0xff]  }
 0x195   :  { %2553 = vmatpush1.bf16.msra.mxu0 %v3407_v43  ;;  %2501 = vmatprep.subr.bf16.mxu1 %v3412_v44  ;;  %v3490_v43 = vld [vmem:[#allocation8 + $0x3a4] ss:$24 sps:$4 sm:$0xff]   ;;  %v3493_v44 = vld [vmem:[#allocation8 + $0x374] ss:$24 sps:$4 sm:$0xff]  }
 0x196   :  { %2554 = vmatprep.subr.bf16.mxu0 %v3415_v45  ;;  %v3491_v45 = vld [vmem:[#allocation8 + $0x370] ss:$24 sps:$4 sm:$0xff]  }
 0x198   :  { %2502 = vmatpush1.bf16.msra.mxu1 %v3410_v18  ;;  %v3496_v18 = vld [vmem:[#allocation8 + $0x344] ss:$24 sps:$4 sm:$0xff]  }
 0x199   :  { %2555 = vmatpush1.bf16.msra.mxu0 %v3413_v46  ;;  %2503 = vmatprep.subr.bf16.mxu1 %v3418_v47  ;;  %v3494_v46 = vld [vmem:[#allocation8 + $0x340] ss:$24 sps:$4 sm:$0xff]   ;;  %v3499_v47 = vld [vmem:[#allocation8 + $0x314] ss:$24 sps:$4 sm:$0xff]  }
 0x19a   :  { %2556 = vmatprep.subr.bf16.mxu0 %v3421_v48  ;;  %v3500_v48 = vld [vmem:[#allocation8 + $0x5e0] ss:$24 sps:$4 sm:$0xff]  }
 0x19c   :  { %2504 = vmatpush1.bf16.msra.mxu1 %v3416_v49  ;;  %v3505_v49 = vld [vmem:[#allocation8 + $0x5b4] ss:$24 sps:$4 sm:$0xff]  }
 0x19d   :  { %2557 = vmatpush1.bf16.msra.mxu0 %v3419_v51  ;;  %2505 = vmatprep.subr.bf16.mxu1 %v3424_v52  ;;  %v3503_v51 = vld [vmem:[#allocation8 + $0x5b0] ss:$24 sps:$4 sm:$0xff]   ;;  %v3508_v52 = vld [vmem:[#allocation8 + $0x584] ss:$24 sps:$4 sm:$0xff]  }
 0x19e   :  { %2558 = vmatprep.subr.bf16.mxu0 %v3427_v53  ;;  %v3506_v53 = vld [vmem:[#allocation8 + $0x580] ss:$24 sps:$4 sm:$0xff]  }
 0x1a0   :  { %2506 = vmatpush1.bf16.msra.mxu1 %v3422_v54  ;;  %v3511_v54 = vld [vmem:[#allocation8 + $0x554] ss:$24 sps:$4 sm:$0xff]  }
 0x1a1   :  { %2559 = vmatpush1.bf16.msra.mxu0 %v3425_v55  ;;  %2507 = vmatprep.subr.bf16.mxu1 %v3430_v56  ;;  %v3509_v55 = vld [vmem:[#allocation8 + $0x550] ss:$24 sps:$4 sm:$0xff]   ;;  %v3514_v56 = vld [vmem:[#allocation8 + $0x524] ss:$24 sps:$4 sm:$0xff]  }
 0x1a2   :  { %2560 = vmatprep.subr.bf16.mxu0 %v3433_v57  ;;  %v3512_v57 = vld [vmem:[#allocation8 + $0x520] ss:$24 sps:$4 sm:$0xff]  }
 0x1a4   :  { %2508 = vmatpush2.bf16.msra.mxu1 %v3428_v58  ;;  %v3517_v58 = vld [vmem:[#allocation8 + $0x4f4] ss:$24 sps:$4 sm:$0xff]  }
 0x1a5   :  { %2561 = vmatpush2.bf16.msra.mxu0 %v3431_v59  ;;  %2509 = vmatprep.subr.bf16.mxu1 %v3436_v60  ;;  %v3515_v59 = vld [vmem:[#allocation8 + $0x4f0] ss:$24 sps:$4 sm:$0xff]   ;;  %v3520_v60 = vld [vmem:[#allocation8 + $0x4c4] ss:$24 sps:$4 sm:$0xff]  }
 0x1a6   :  { %2562 = vmatprep.subr.bf16.mxu0 %v3439_v61  ;;  %v3518_v61 = vld [vmem:[#allocation8 + $0x4c0] ss:$24 sps:$4 sm:$0xff]  }
 0x1a8   :  { %2510 = vmatpush2.bf16.msra.mxu1 %v3434_v62  ;;  %v3523_v62 = vld [vmem:[#allocation8 + $0x494] ss:$24 sps:$4 sm:$0xff]  }
 0x1a9   :  { %2563 = vmatpush2.bf16.msra.mxu0 %v3437_v1  ;;  %2511 = vmatprep.subr.bf16.mxu1 %v3442_v2  ;;  %v3521_v1 = vld [vmem:[#allocation8 + $0x490] ss:$24 sps:$4 sm:$0xff]  }
 0x1aa   :  { %2564 = vmatprep.subr.bf16.mxu0 %v3445_v3 }
 0x1ac   :  { %2512 = vmatpush2.bf16.msra.mxu1 %v3440_v6  ;;  %v3780_v6 = vld [vmem:[%s3805_s4] sm:$0x3f]  ;;  %s3640_s4 = smov [#allocation10]  }
 0x1ad   :  { %2565 = vmatpush2.bf16.msra.mxu0 %v3443_v8  ;;  %2513 = vmatprep.subr.bf16.mxu1 %v3448_v9  ;;  %v1345_v9 = vrot.slane %v3780_v6, %v214_v20  ;;  %s2679_s15 = sshll.u32 %s3640_s4, 4  ;;  %s2680_s15 = int_to_ptr.vmem [resolvable:$true] %s2679_s15 }
 0x1ae   :  { %2566 = vmatprep.subr.bf16.mxu0 %v3451_v12  ;;  %s3604_s16 = scalar_lea.vmem %s2680_s15, 3072  ;;  %p3609_p7 = scmp.lt.s32.totalorder %s2680_s15, %s2680_s15 }
 0x1af   :  { %p3605_p6 = scmp.ne.s32.totalorder %s2680_s15, %s3604_s16  ;;  %p3610_p8 = scmp.lt.s32.totalorder %s3604_s16, %s3604_s16 }
 0x1b0   :  { %2514 = vmatpush2.bf16.msra.mxu1 %v3446_v14 }
 0x1b1   :  { %2567 = vmatpush2.bf16.msra.mxu0 %v3449_v21  ;;  %2515 = vmatprep.subr.bf16.mxu1 %v3454_v4  ;;  %p3611_p9 = por %p3610_p8, %p3609_p7 }
 0x1b2   :  { %2568 = vmatprep.subr.bf16.mxu0 %v3457_v5 }
 0x1b3   :  { %p3612_p10 = pnand %p3611_p9, %p3605_p6 }
 0x1b4   :  { %2516 = vmatpush2.bf16.msra.mxu1 %v3452_v10 }
 0x1b5   :  { %2569 = vmatpush2.bf16.msra.mxu0 %v3455_v11  ;;  %2517 = vmatprep.subr.bf16.mxu1 %v3460_v22 }
 0x1b6   :  { %2570 = vmatprep.subr.bf16.mxu0 %v3463_v23 }
 0x1b8   :  { %2518 = vmatpush2.bf16.msra.mxu1 %v3458_v24 }
 0x1b9   :  { %2571 = vmatpush2.bf16.msra.mxu0 %v3461_v25  ;;  %2519 = vmatprep.subr.bf16.mxu1 %v3466_v16 }
 0x1ba   :  { %2572 = vmatprep.subr.bf16.mxu0 %v3469_v27 }
 0x1bc   :  { %2520 = vmatpush2.bf16.msra.mxu1 %v3464_v28 }
 0x1bd   :  { %2573 = vmatpush2.bf16.msra.mxu0 %v3467_v29  ;;  %2521 = vmatprep.subr.bf16.mxu1 %v3472_v30 }
 0x1be   :  { %2574 = vmatprep.subr.bf16.mxu0 %v3475_v31 }
 0x1c0   :  { %2522 = vmatpush2.bf16.msra.mxu1 %v3470_v34 }
 0x1c1   :  { %2575 = vmatpush2.bf16.msra.mxu0 %v3473_v35  ;;  %2597 = vmatprep.subr.bf16.mxu1 %v3478_v36 }
 0x1c3   :  { %2524 = vmatmul.mubr.bf16.vlgmr.msra.gmra.mxu1 %v3752_v13 }
 0x1c4   :  { %2577 = vmatmul.mubr.bf16.vlgmr.msra.gmra.mxu0 %v3731_v50  ;;  %2533 = vmatprep.mubr.bf16.mxu1 %v3760_v33  ;;  %v3485_v50 = vld [vmem:[#allocation8 + $0x3d0] ss:$24 sps:$4 sm:$0xff]  }
 0x1c5   :  { %2586 = vmatprep.mubr.bf16.mxu0 %v3737_v0  ;;  %2598 = vmatpush1.bf16.msra.mxu1 %v3476_v37  ;;  %v3488_v0 = vld [vmem:[#allocation8 + $0x3a0] ss:$24 sps:$4 sm:$0xff]  }
 0x1c6   :  { %2599 = vmatprep.subr.bf16.mxu1 %v3481_v38 }
 0x1c9   :  { %2600 = vmatpush1.bf16.msra.mxu1 %v3479_v39 }
 0x1ca   :  { %2601 = vmatprep.subr.bf16.mxu1 %v3484_v40 }
 0x1cb   :  { %2534 = vmatmul.mubr.bf16.gmra.mxu1 %v3758_v32 }
 0x1cc   :  { %2587 = vmatmul.mubr.bf16.gmra.mxu0 %v3735_v63  ;;  %2629 = vmatprep.mubr.bf16.mxu1 %v3750_v7  ;;  %v3497_v63 = vld [vmem:[#allocation8 + $0x310] ss:$24 sps:$4 sm:$0xff]   ;;  %v3502_v7 = vld [vmem:[#allocation8 + $0x5e4] ss:$24 sps:$4 sm:$0xff]  }
 0x1cd   :  { %2602 = vmatpush1.bf16.msra.mxu1 %v3482_v41 }
 0x1ce   :  { %2603 = vmatprep.subr.bf16.mxu1 %v3487_v42 }
 0x1d1   :  { %2604 = vmatpush1.bf16.msra.mxu1 %v3485_v50 }
 0x1d2   :  { %2605 = vmatprep.subr.bf16.mxu1 %v3490_v43 }
 0x1d5   :  { %2606 = vmatpush1.bf16.msra.mxu1 %v3488_v0 }
 0x1d6   :  { %2607 = vmatprep.subr.bf16.mxu1 %v3493_v44  ;;  %v1353_v44 = vrot.slane %v3780_v6, %v222_v26 }
 0x1d9   :  { %2608 = vmatpush1.bf16.msra.mxu1 %v3491_v45  ;;  %v1357_v45 = vrot.slane %v3780_v6, %v226_v19 }
 0x1da   :  { %2609 = vmatprep.subr.bf16.mxu1 %v3496_v18 }
 0x1dd   :  { %2610 = vmatpush1.bf16.msra.mxu1 %v3494_v46 }
 0x1de   :  { %2611 = vmatprep.subr.bf16.mxu1 %v3499_v47 }
 0x1e1   :  { %2612 = vmatpush1.bf16.msra.mxu1 %v3497_v63 }
 0x1e2   :  { %2613 = vmatprep.subr.bf16.mxu1 %v3502_v7 }
 0x1e5   :  { %2614 = vmatpush2.bf16.msra.mxu1 %v3500_v48 }
 0x1e6   :  { %2615 = vmatprep.subr.bf16.mxu1 %v3505_v49 }
 0x1e9   :  { %2616 = vmatpush2.bf16.msra.mxu1 %v3503_v51 }
 0x1ea   :  { %2617 = vmatprep.subr.bf16.mxu1 %v3508_v52 }
 0x1ed   :  { %2618 = vmatpush2.bf16.msra.mxu1 %v3506_v53 }
 0x1ee   :  { %2619 = vmatprep.subr.bf16.mxu1 %v3511_v54 }
 0x1f1   :  { %2620 = vmatpush2.bf16.msra.mxu1 %v3509_v55 }
 0x1f2   :  { %2621 = vmatprep.subr.bf16.mxu1 %v3514_v56 }
 0x1f5   :  { %2622 = vmatpush2.bf16.msra.mxu1 %v3512_v57 }
 0x1f6   :  { %2623 = vmatprep.subr.bf16.mxu1 %v3517_v58 }
 0x1f9   :  { %2624 = vmatpush2.bf16.msra.mxu1 %v3515_v59 }
 0x1fa   :  { %2625 = vmatprep.subr.bf16.mxu1 %v3520_v60 }
 0x1fd   :  { %2626 = vmatpush2.bf16.msra.mxu1 %v3518_v61 }
 0x1fe   :  { %2627 = vmatprep.subr.bf16.mxu1 %v3523_v62 }
 0x201   :  { %2628 = vmatpush2.bf16.msra.mxu1 %v3521_v1 }
 0x203   :  { %v2366_v2 = vpop.f32.mrf.mxu0 }
 0x204   :  { %2630 = vmatmul.mubr.bf16.vlgmr.msra.gmra.mxu1 %v3752_v13  ;;  %v1349_v13 = vrot.slane %v3780_v6, %v218_v17  ;;  %v2367_v14 = vadd.f32 %v2366_v2, %v1345_v9 }
 0x205   :  { %2639 = vmatprep.mubr.bf16.mxu1 %v3760_v33  ;;  %v2368_v3 = vpop.f32.mrf.mxu0 }
 0x206   :  { %v2369_v21 = vadd.f32 %v2368_v3, %v1349_v13 }
 0x207   :  { %v2370_v8 = vpop.f32.mrf.mxu0 }
 0x208   :  { %v2371_v11 = vadd.f32 %v2370_v8, %v1345_v9 }
 0x209   :  { %v2372_v12 = vpop.f32.mrf.mxu0 }
 0x20a   :  { %v2373_v24 = vadd.f32 %v2372_v12, %v1349_v13 }
 0x20b   :  { %v2376_v33 = vpop.f32.mrf.mxu0 }
 0x20c   :  { %2640 = vmatmul.mubr.bf16.gmra.mxu1 %v3758_v32  ;;  %v2377_v27 = vadd.f32 %v2376_v33, %v1345_v9 }
 0x20d   :  { %v2378_v5 = vpop.f32.mrf.mxu0 }
 0x20e   :  { %v2379_v29 = vadd.f32 %v2378_v5, %v1349_v13 }
 0x20f   :  { %v2380_v20 = vpop.f32.mrf.mxu0 }
 0x210   :  { %v2381_v35 = vadd.f32 %v2380_v20, %v1345_v9 }
 0x211   :  { %v2382_v31 = vpop.f32.mrf.mxu0 }
 0x212   :  { %v2383_v38 = vadd.f32 %v2382_v31, %v1349_v13 }
 0x243   :  { %v2419_v32 = vpop.f32.mrf.mxu1  ;;  %v2472_v42 = vpop.f32.mrf.mxu0 }
 0x244   :  { %v2420_v4 = vadd.f32 %v2419_v32, %v2367_v14  ;;  %v2473_v46 = vadd.f32 %v2472_v42, %v1353_v44 }
 0x245   :  { %v2421_v10 = vpop.f32.mrf.mxu1  ;;  %v2474_v50 = vpop.f32.mrf.mxu0 }
 0x246   :  { %2650 = vst [vmem:[#allocation10] sm:$0xff] %v2420_v4  ;;  %v2422_v22 = vadd.f32 %v2421_v10, %v2369_v21  ;;  %v2475_v63 = vadd.f32 %v2474_v50, %v1357_v45  ;;  %v1360_v21 = vsub.s32 4, %v3717_v15  ;;  %v1364_v4 = vsub.s32 5, %v3717_v15 }
 0x247   :  { %v2423_v23 = vpop.f32.mrf.mxu1  ;;  %v2476_v43 = vpop.f32.mrf.mxu0 }
 0x248   :  { %2651 = vst [vmem:[#allocation10 + $0x8] sm:$0xff] %v2422_v22  ;;  %v2424_v25 = vadd.f32 %v2423_v23, %v2371_v11  ;;  %v2477_v51 = vadd.f32 %v2476_v43, %v1353_v44  ;;  %v1361_v10 = vrot.slane %v3780_v6, %v1360_v21  ;;  %v1365_v11 = vrot.slane %v3780_v6, %v1364_v4 }
 0x249   :  { %v2425_v16 = vpop.f32.mrf.mxu1  ;;  %v2478_v0 = vpop.f32.mrf.mxu0 }
 0x24a   :  { %2656 = vst [vmem:[#allocation10 + $0x30] sm:$0xff] %v2424_v25  ;;  %v2426_v28 = vadd.f32 %v2425_v16, %v2373_v24  ;;  %v2479_v54 = vadd.f32 %v2478_v0, %v1357_v45 }
 0x24b   :  { %v2429_v17 = vpop.f32.mrf.mxu1  ;;  %v2482_v18 = vpop.f32.mrf.mxu0 }
 0x24c   :  { %2657 = vst [vmem:[#allocation10 + $0x38] sm:$0xff] %v2426_v28  ;;  %v2430_v30 = vadd.f32 %v2429_v17, %v2377_v27  ;;  %v2483_v57 = vadd.f32 %v2482_v18, %v1353_v44 }
 0x24d   :  { %v2431_v34 = vpop.f32.mrf.mxu1  ;;  %v2484_v48 = vpop.f32.mrf.mxu0 }
 0x24e   :  { %2662 = vst [vmem:[#allocation10 + $0x60] sm:$0xff] %v2430_v30  ;;  %v2432_v36 = vadd.f32 %v2431_v34, %v2379_v29  ;;  %v2485_v59 = vadd.f32 %v2484_v48, %v1357_v45 }
 0x24f   :  { %v2433_v37 = vpop.f32.mrf.mxu1  ;;  %v2486_v56 = vpop.f32.mrf.mxu0 }
 0x250   :  { %2663 = vst [vmem:[#allocation10 + $0x68] sm:$0xff] %v2432_v36  ;;  %v2434_v39 = vadd.f32 %v2433_v37, %v2381_v35  ;;  %v2487_v1 = vadd.f32 %v2486_v56, %v1353_v44 }
 0x251   :  { %v2435_v40 = vpop.f32.mrf.mxu1  ;;  %v2488_v61 = vpop.f32.mrf.mxu0 }
 0x252   :  { %2668 = vst [vmem:[#allocation10 + $0x90] sm:$0xff] %v2434_v39  ;;  %v2436_v41 = vadd.f32 %v2435_v40, %v2383_v38  ;;  %v2489_v8 = vadd.f32 %v2488_v61, %v1357_v45 }
 0x254   :  { %2669 = vst [vmem:[#allocation10 + $0x98] sm:$0xff] %v2436_v41 }
 0x283   :  { %v2525_v47 = vpop.f32.mrf.mxu1 }
 0x284   :  { %v2526_v7 = vadd.f32 %v2525_v47, %v2473_v46  ;;  %v2578_v33 = vpop.f32.mrf.mxu0 }
 0x285   :  { %v2527_v49 = vpop.f32.mrf.mxu1  ;;  %v2579_v23 = vadd.f32 %v2578_v33, %v1361_v10 }
 0x286   :  { %2652 = vst [vmem:[#allocation10 + $0x10] sm:$0xff] %v2526_v7  ;;  %v2528_v52 = vadd.f32 %v2527_v49, %v2475_v63  ;;  %v2580_v14 = vpop.f32.mrf.mxu0 }
 0x287   :  { %v2529_v53 = vpop.f32.mrf.mxu1  ;;  %v2581_v25 = vadd.f32 %v2580_v14, %v1365_v11 }
 0x288   :  { %2653 = vst [vmem:[#allocation10 + $0x18] sm:$0xff] %v2528_v52  ;;  %v2530_v55 = vadd.f32 %v2529_v53, %v2477_v51  ;;  %v2582_v32 = vpop.f32.mrf.mxu0 }
 0x289   :  { %v2531_v26 = vpop.f32.mrf.mxu1  ;;  %v2583_v28 = vadd.f32 %v2582_v32, %v1361_v10 }
 0x28a   :  { %2658 = vst [vmem:[#allocation10 + $0x40] sm:$0xff] %v2530_v55  ;;  %v2532_v58 = vadd.f32 %v2531_v26, %v2479_v54  ;;  %v2584_v5 = vpop.f32.mrf.mxu0 }
 0x28b   :  { %v2535_v19 = vpop.f32.mrf.mxu1  ;;  %v2585_v30 = vadd.f32 %v2584_v5, %v1365_v11 }
 0x28c   :  { %2659 = vst [vmem:[#allocation10 + $0x48] sm:$0xff] %v2532_v58  ;;  %v2536_v60 = vadd.f32 %v2535_v19, %v2483_v57  ;;  %v2588_v22 = vpop.f32.mrf.mxu0 }
 0x28d   :  { %v2537_v62 = vpop.f32.mrf.mxu1  ;;  %v2589_v35 = vadd.f32 %v2588_v22, %v1361_v10 }
 0x28e   :  { %2664 = vst [vmem:[#allocation10 + $0x70] sm:$0xff] %v2536_v60  ;;  %v2538_v2 = vadd.f32 %v2537_v62, %v2485_v59  ;;  %v2590_v16 = vpop.f32.mrf.mxu0 }
 0x28f   :  { %v2539_v3 = vpop.f32.mrf.mxu1  ;;  %v2591_v37 = vadd.f32 %v2590_v16, %v1365_v11 }
 0x290   :  { %2665 = vst [vmem:[#allocation10 + $0x78] sm:$0xff] %v2538_v2  ;;  %v2540_v9 = vadd.f32 %v2539_v3, %v2487_v1  ;;  %v2592_v15 = vpop.f32.mrf.mxu0 }
 0x291   :  { %v2541_v12 = vpop.f32.mrf.mxu1  ;;  %v2593_v41 = vadd.f32 %v2592_v15, %v1361_v10 }
 0x292   :  { %2670 = vst [vmem:[#allocation10 + $0xa0] sm:$0xff] %v2540_v9  ;;  %v2542_v13 = vadd.f32 %v2541_v12, %v2489_v8  ;;  %v2594_v39 = vpop.f32.mrf.mxu0 }
 0x293   :  { %v2595_v43 = vadd.f32 %v2594_v39, %v1365_v11 }
 0x294   :  { %2671 = vst [vmem:[#allocation10 + $0xa8] sm:$0xff] %v2542_v13 }
 0x2c4   :  { %v2631_v24 = vpop.f32.mrf.mxu1 }
 0x2c5   :  { %v2632_v20 = vadd.f32 %v2631_v24, %v2579_v23 }
 0x2c6   :  { %v2633_v27 = vpop.f32.mrf.mxu1 }
 0x2c7   :  { %2654 = vst [vmem:[#allocation10 + $0x20] sm:$0xff] %v2632_v20  ;;  %v2634_v17 = vadd.f32 %v2633_v27, %v2581_v25 }
 0x2c8   :  { %v2635_v29 = vpop.f32.mrf.mxu1 }
 0x2c9   :  { %2655 = vst [vmem:[#allocation10 + $0x28] sm:$0xff] %v2634_v17  ;;  %v2636_v31 = vadd.f32 %v2635_v29, %v2583_v28 }
 0x2ca   :  { %v2637_v34 = vpop.f32.mrf.mxu1 }
 0x2cb   :  { %2660 = vst [vmem:[#allocation10 + $0x50] sm:$0xff] %v2636_v31  ;;  %v2638_v36 = vadd.f32 %v2637_v34, %v2585_v30 }
 0x2cc   :  { %v2641_v6 = vpop.f32.mrf.mxu1 }
 0x2cd   :  { %2661 = vst [vmem:[#allocation10 + $0x58] sm:$0xff] %v2638_v36  ;;  %v2642_v38 = vadd.f32 %v2641_v6, %v2589_v35 }
 0x2ce   :  { %v2643_v40 = vpop.f32.mrf.mxu1 }
 0x2cf   :  { %2666 = vst [vmem:[#allocation10 + $0x80] sm:$0xff] %v2642_v38  ;;  %v2644_v42 = vadd.f32 %v2643_v40, %v2591_v37 }
 0x2d0   :  { %v2645_v50 = vpop.f32.mrf.mxu1 }
 0x2d1   :  { %2667 = vst [vmem:[#allocation10 + $0x88] sm:$0xff] %v2644_v42  ;;  %v2646_v0 = vadd.f32 %v2645_v50, %v2593_v41 }
 0x2d2   :  { %v2647_v44 = vpop.f32.mrf.mxu1 }
 0x2d3   :  { %2672 = vst [vmem:[#allocation10 + $0xb0] sm:$0xff] %v2646_v0  ;;  %v2648_v45 = vadd.f32 %v2647_v44, %v2595_v43 }
 0x2d5   :  { %2673 = vst [vmem:[#allocation10 + $0xb8] sm:$0xff] %v2648_v45 }
 0x2d6   :  { %3615 = shalt.err (!%p3612_p10)
}
 0x2d7   :  { %s3641_s17 = smov 768   ;;  %s3642_s18 = smov 48  }
 0x2d8   :  { %2685 = dma.vmem_to_hbm [thread:$0]  %s2680_s15, 3072, %s3806_s5, [#allocation4], %s3641_s17, %s3641_s17, %s3642_s18  }
 0x2d9   :  { %3630 = dma.done.wait [#allocation4], 3072  }
 0x2da   :  { %3631 = vsyncadd [#allocation4], 4294964224 }
 0x2db   :  { %2689 = vsyncpa [#allocation3], 1 }
 0x2dc   :  { %2690 = vsyncpa [#allocation6], 1 }
 0x2dd   :  { %2691 = vsyncpa [#allocation9], 1 }
 0x2de   :  { %2692 = vsyncpa [#allocation4], 1 }

</bundles_post_ra>
